<compile_context>
chip_gen: v7x
topology: tpu7x:2x2x1
jax: 0.10.0
libtpu: 0.0.40
codegen_flags: <defaults>
</compile_context>

<pallas_src>
import functools
import re

import jax
import jax.numpy as jnp
from jax import lax
from jax.experimental import pallas as pl
from jax.experimental.pallas import tpu as pltpu


# ----------------------------------------------------------------------------
# hardware-aware knobs
# ----------------------------------------------------------------------------
@functools.lru_cache(maxsize=None)
def _tpu_vmem_and_generation():
    """Best-effort (vmem_capacity_bytes, tpu_generation) query."""
    gen = None
    try:
        kind = jax.devices()[0].device_kind.lower()
        m = re.search(r"v(\d+)", kind)
        if m:
            gen = int(m.group(1))
    except Exception:
        pass
    vmem = None
    try:
        vmem = int(pltpu.get_tpu_info().vmem_capacity_bytes)
    except Exception:
        pass
    if vmem is None:
        # Conservative fallback: 128 MiB on <=v6, 64 MiB otherwise (v7x).
        vmem = 128 * 2**20 if (gen is not None and gen <= 6) else 64 * 2**20
    return vmem, gen


def _pick_vmem_limit(vmem_cap):
    if vmem_cap <= 64 * 2**20:              # v7x: 64 MiB/TC -> leave headroom
        return int(vmem_cap * 0.6)          # ~38 MiB
    return min(100 * 2**20, int(vmem_cap * 0.8))   # v5e/v6e 128 MiB parts


def _pick_cout_tile(cout, gen):
    """MXU-width Cout tiles: 256 fills the 2x256x256 MXU on v6e/v7x; 128
    already saturates the 4x128x128 MXU on v5e."""
    preferred = 128 if (gen is not None and gen <= 5) else 256
    for ct in (preferred, 256, 128):
        if cout >= ct and cout % ct == 0:
            return ct
    return cout


def _round_up(x, m):
    return ((x + m - 1) // m) * m


def _pick_row_tile(ho, wop, target_m=256):
    """Output-row tile: M = Tho * Wop ~= target_m MXU rows per grid step
    (always a multiple of 8 because Wop is)."""
    return max(1, min(ho, target_m // wop))


def _spec(block_shape, index_map, buffer_count=None):
    """BlockSpec with optional pipeline-depth override; falls back silently
    if this Pallas build does not support `pipeline_mode`."""
    if buffer_count is not None:
        try:
            return pl.BlockSpec(block_shape, index_map,
                                pipeline_mode=pl.Buffered(buffer_count))
        except Exception:
            pass
    return pl.BlockSpec(block_shape, index_map)


# ----------------------------------------------------------------------------
# kernel
# ----------------------------------------------------------------------------
def _conv3x3_s2_kernel(x_ref, w_ref, b_ref, o_ref, acc_ref, *, Tho, Wop):
    """One (batch, Cout-tile, row-tile) grid step.

    x_ref:   (4, Hh, Wh, Cin)   parity planes (index = ph*2+pw) of the
                                zero-padded bf16 input of this batch element.
    w_ref:   (3, 3, Cin, Ct)    bf16 weights of this Cout tile.
    b_ref:   (1, Ct)            f32 bias.
    o_ref:   (1, Tho, Wop, Ct)  conv output tile.
    acc_ref: (Tho*Wop, Ct)      f32 VMEM scratch accumulator.
    """
    cin = x_ref.shape[-1]
    ct = o_ref.shape[-1]
    m = Tho * Wop
    r0 = pl.program_id(2) * Tho               # first output row of this tile
    if Tho % 8 == 0:
        r0 = pl.multiple_of(r0, 8)

    # 3x3 stride-2 conv == 9 accumulated MXU matmuls, one per kernel tap.
    # Padded-input row 2*r + kh lives in parity plane (kh & 1) at half-row
    # r + (kh >> 1); same decomposition for columns -> contiguous slices only.
    # Accumulation goes through a VMEM scratch ref (first tap writes, the
    # rest add) so the f32 (M, Ct) accumulator never spills through vregs.
    # TODO(synk): when Cin % 128 == 0 (256/2048) fold the 9 taps into one
    # deep-K matmul ((M, 9*Cin) x (9*Cin, Ct)) — highest value on v5e.
    first = True
    for kh in range(3):
        ph, dh = kh & 1, kh >> 1
        for kw in range(3):
            pw, dw = kw & 1, kw >> 1
            slab = x_ref[ph * 2 + pw, pl.ds(r0 + dh, Tho), pl.ds(dw, Wop), :]
            tap = jnp.dot(slab.reshape(m, cin), w_ref[kh, kw],
                          preferred_element_type=jnp.float32)
            if first:
                acc_ref[...] = tap
                first = False
            else:
                acc_ref[...] += tap

    y = acc_ref[...] + b_ref[...]
    # Wop % 8 == 0 -> this reshape does not cross (8,128) sublane tiles.
    o_ref[0] = y.reshape(Tho, Wop, ct).astype(o_ref.dtype)


# ----------------------------------------------------------------------------
# wrapper
# ----------------------------------------------------------------------------
def conv3x3_s2_pallas(x_nhwc, w_oihw, b, *, relu_input=False,
                      out_dtype=jnp.float32):
    """3x3 / stride-2 / pad-1 conv + bias.  Optional ReLU on the input is
    fused into the (already existing) bf16-cast / parity-split layout pass."""
    N, H, W, Cin = x_nhwc.shape
    Cout = w_oihw.shape[0]
    Ho = (H - 1) // 2 + 1
    Wo = (W - 1) // 2 + 1

    vmem_cap, gen = _tpu_vmem_and_generation()
    vmem_limit = _pick_vmem_limit(vmem_cap)

    Ct = _pick_cout_tile(Cout, gen)
    n_ct = Cout // Ct
    Wop = _round_up(Wo, 8)                    # lane/sublane-friendly width
    Tho = _pick_row_tile(Ho, Wop)
    n_rt = -(-Ho // Tho)                      # cdiv
    Hop = n_rt * Tho                          # padded output rows

    # ---- layout-only glue (fuses into ~one XLA copy): optional ReLU, cast
    #      to bf16, zero-pad, split into row/col parity planes.  Extra pad
    #      rows/cols are zeros and only feed output rows/cols >= Ho/Wo,
    #      which are sliced off below.
    xb = x_nhwc
    if relu_input:
        xb = jnp.maximum(xb, 0)
    xb = xb.astype(jnp.bfloat16)
    Hh, Wh = Hop + 1, Wop + 1                 # half-rows/cols incl. halo
    xp = jnp.pad(xb, ((0, 0), (1, 2 * Hh - 1 - H), (1, 2 * Wh - 1 - W), (0, 0)))
    planes = xp.reshape(N, Hh, 2, Wh, 2, Cin).transpose(0, 2, 4, 1, 3, 5)
    planes = planes.reshape(N * 4, Hh, Wh, Cin)   # plane index = ph*2 + pw

    # (Cout, Cin, 3, 3) -> (3, 3, Cin, Cout): one (Cin, Ct) operand per tap.
    w = jnp.transpose(w_oihw, (2, 3, 1, 0)).astype(jnp.bfloat16)
    b2 = b.reshape(1, Cout).astype(jnp.float32)

    # ---- buffering: the per-batch input slab only changes with the batch
    # axis; single-buffer it (and big weight blocks that never change) when
    # double-buffering everything would not fit the generation's VMEM budget.
    in_block_bytes = 4 * Hh * Wh * Cin * 2
    w_block_bytes = 9 * Cin * Ct * 2
    out_block_bytes = Tho * Wop * Ct * 4
    acc_bytes = Tho * Wop * Ct * 4
    dbl = 2 * (in_block_bytes + w_block_bytes + out_block_bytes) + acc_bytes
    in_bufs = 1 if dbl > int(0.85 * vmem_limit) else None
    w_bufs = 1 if (n_ct == 1 and w_block_bytes >= (4 << 20)) else None
    # TODO(synk): if a single input slab itself exceeds the VMEM budget
    # (very large C5 maps on v7x), row-tile the planes with a 1-half-row halo.

    flops = 2 * 9 * Cin * Cout * N * Ho * Wo
    bytes_accessed = (planes.size * 2 + w.size * 2 + b2.size * 4
                      + N * Hop * Wop * Cout * 4)
    cost = pl.CostEstimate(flops=flops, transcendentals=0,
                           bytes_accessed=bytes_accessed)

    kernel = functools.partial(_conv3x3_s2_kernel, Tho=Tho, Wop=Wop)
    y = pl.pallas_call(
        kernel,
        out_shape=jax.ShapeDtypeStruct((N, Hop, Wop, Cout), out_dtype),
        grid=(N, n_ct, n_rt),
        in_specs=[
            # Full parity-plane slab of batch n; block index is constant over
            # (ct, rt) so it is DMA'd once per batch element.
            _spec((4, Hh, Wh, Cin), lambda n, ct, rt: (n, 0, 0, 0), in_bufs),
            _spec((3, 3, Cin, Ct), lambda n, ct, rt: (0, 0, 0, ct), w_bufs),
            _spec((1, Ct), lambda n, ct, rt: (0, ct)),
        ],
        out_specs=pl.BlockSpec((1, Tho, Wop, Ct),
                               lambda n, ct, rt: (n, rt, 0, ct)),
        scratch_shapes=[pltpu.VMEM((Tho * Wop, Ct), jnp.float32)],
        compiler_params=pltpu.CompilerParams(
            dimension_semantics=("parallel", "parallel", "parallel"),
            vmem_limit_bytes=vmem_limit),
        cost_estimate=cost,
    )(planes, w, b2)

    if (Hop, Wop) != (Ho, Wo):
        y = y[:, :Ho, :Wo, :]     # fuses with the consumer's layout pass
    return y


# ----------------------------------------------------------------------------
# module: init + forward
# ----------------------------------------------------------------------------
def c2_xavier_fill_params(key, cin, cout):
    """Deterministic stand-in for detectron2's c2_xavier_fill:
    kaiming_uniform_(a=1) on the weight, zeros for the bias."""
    fan_in = cin * 3 * 3
    bound = (3.0 / fan_in) ** 0.5
    w = jax.random.uniform(key, (cout, cin, 3, 3), jnp.float32, -bound, bound)
    b = jnp.zeros((cout,), jnp.float32)
    return w, b


def init_last_level_p6p7(key, in_channels, out_channels):
    k6, k7 = jax.random.split(key)
    p6_w, p6_b = c2_xavier_fill_params(k6, in_channels, out_channels)
    p7_w, p7_b = c2_xavier_fill_params(k7, out_channels, out_channels)
    return {"p6_w": p6_w, "p6_b": p6_b, "p7_w": p7_w, "p7_b": p7_b}


def last_level_p6p7(params, x_nchw):
    """Forward pass of LastLevelP6P7.  x_nchw: (N, Cin, H, W), float32."""
    x = jnp.transpose(x_nchw, (0, 2, 3, 1))                  # NCHW -> NHWC
    p6 = conv3x3_s2_pallas(x, params["p6_w"], params["p6_b"])
    # F.relu(p6) is applied on the p6 -> p7 input path (fused into the bf16
    # cast / parity-split pass), so p6 itself is written to HBM exactly once.
    p7 = conv3x3_s2_pallas(p6, params["p7_w"], params["p7_b"],
                           relu_input=True)                   # p6 stays NHWC
    return {"p6": jnp.transpose(p6, (0, 3, 1, 2)),            # NHWC -> NCHW
            "p7": jnp.transpose(p7, (0, 3, 1, 2))}


# ----------------------------------------------------------------------------
# reference + test
# ----------------------------------------------------------------------------
def _conv_ref_nchw(x_nchw, w_oihw, b, *, relu_input=False):
    """XLA reference with the same bf16-operand / f32-accumulate recipe."""
    if relu_input:
        x_nchw = jax.nn.relu(x_nchw)
    y = lax.conv_general_dilated(
        x_nchw.astype(jnp.bfloat16), w_oihw.astype(jnp.bfloat16),
        window_strides=(2, 2), padding=((1, 1), (1, 1)),
        dimension_numbers=("NCHW", "OIHW", "NCHW"),
        preferred_element_type=jnp.float32)
    return y + b.reshape(1, -1, 1, 1)


if __name__ == "__main__":
    key = jax.random.PRNGKey(0)
    k_x, k_p = jax.random.split(key)
    in_channels, out_channels = 4, 8
    x = jax.random.normal(k_x, (2, in_channels, 16, 16), jnp.float32)
    params = init_last_level_p6p7(k_p, in_channels, out_channels)

    out = jax.jit(last_level_p6p7)(params, x)
    jax.block_until_ready(out)

    # reference check against XLA convolutions (same bf16 operand casts)
    p6_ref = _conv_ref_nchw(x, params["p6_w"], params["p6_b"])
    p7_ref = _conv_ref_nchw(p6_ref, params["p7_w"], params["p7_b"],
                            relu_input=True)
    assert out["p6"].shape == (2, out_channels, 8, 8)
    assert out["p7"].shape == (2, out_channels, 4, 4)
    assert jnp.allclose(out["p6"], p6_ref, atol=1e-2, rtol=1e-2)
    assert jnp.allclose(out["p7"], p7_ref, atol=1e-2, rtol=1e-2)
    print("KERNEL_OK")
</pallas_src>

<mosaic_0001>
module attributes {stable_mosaic.version = 11 : i64} {
  func.func @_conv3x3_s2_kernel(%arg0: i32, %arg1: i32, %arg2: i32, %arg3: memref<4x9x9x4xbf16, #tpu.memory_space<vmem>>, %arg4: memref<3x3x4x8xbf16, #tpu.memory_space<vmem>>, %arg5: memref<1x8xf32, #tpu.memory_space<vmem>>, %arg6: memref<1x8x8x8xf32, #tpu.memory_space<vmem>>, %arg7: memref<64x8xf32, #tpu.memory_space<vmem>>) attributes {dimension_semantics = [#tpu.dimension_semantics<parallel>, #tpu.dimension_semantics<parallel>, #tpu.dimension_semantics<parallel>], iteration_bounds = array<i64: 2, 1, 1>, scalar_prefetch = 0 : i64, scratch_operands = 1 : i64, tpu.core_type = #tpu.core_type<tc>, window_params = [{transform_indices = @transform_0, window_bounds = array<i64: 4, 9, 9, 4>}, {transform_indices = @transform_1, window_bounds = array<i64: 3, 3, 4, 8>}, {transform_indices = @transform_2, window_bounds = array<i64: 1, 8>}, {transform_indices = @transform_3, window_bounds = array<i64: 1, 8, 8, 8>}]} {
    %c8_i32 = arith.constant 8 : i32
    %0 = arith.muli %arg2, %c8_i32 : i32
    %1 = tpu.assume_multiple %0, 8 : i32
    %c0_i32 = arith.constant 0 : i32
    %2 = arith.addi %1, %c0_i32 : i32
    %c0 = arith.constant 0 : index
    %3 = arith.index_cast %2 : i32 to index
    %c0_0 = arith.constant 0 : index
    %c0_1 = arith.constant 0 : index
    %4 = vector.load %arg3[%c0, %3, %c0_0, %c0_1] : memref<4x9x9x4xbf16, #tpu.memory_space<vmem>>, vector<1x8x8x4xbf16>
    %5 = vector.shape_cast %4 : vector<1x8x8x4xbf16> to vector<8x8x4xbf16>
    %6 = vector.shape_cast %5 : vector<8x8x4xbf16> to vector<64x4xbf16>
    %c0_2 = arith.constant 0 : index
    %c0_3 = arith.constant 0 : index
    %c0_4 = arith.constant 0 : index
    %c0_5 = arith.constant 0 : index
    %7 = vector.load %arg4[%c0_2, %c0_3, %c0_4, %c0_5] : memref<3x3x4x8xbf16, #tpu.memory_space<vmem>>, vector<1x1x4x8xbf16>
    %8 = vector.shape_cast %7 : vector<1x1x4x8xbf16> to vector<4x8xbf16>
    %cst = arith.constant dense<0.000000e+00> : vector<64x8xf32>
    %9 = tpu.matmul %6, %8, %cst {dimension_numbers = #tpu.dot_dimension_numbers<[1], [0], [0], [1], [0, 0, 1, 1], [], []>} : vector<64x4xbf16>, vector<4x8xbf16>, vector<64x8xf32> -> vector<64x8xf32>
    %c0_6 = arith.constant 0 : index
    %c0_7 = arith.constant 0 : index
    %10 = vector.load %arg7[%c0_6, %c0_7] : memref<64x8xf32, #tpu.memory_space<vmem>>, vector<64x8xf32>
    tpu.vector_store %arg7[%c0_6, %c0_7], %9 {strides = array<i32>} : memref<64x8xf32, #tpu.memory_space<vmem>>, vector<64x8xf32>,
    %c0_i32_8 = arith.constant 0 : i32
    %11 = arith.addi %1, %c0_i32_8 : i32
    %c1 = arith.constant 1 : index
    %12 = arith.index_cast %11 : i32 to index
    %c0_9 = arith.constant 0 : index
    %c0_10 = arith.constant 0 : index
    %13 = vector.load %arg3[%c1, %12, %c0_9, %c0_10] : memref<4x9x9x4xbf16, #tpu.memory_space<vmem>>, vector<1x8x8x4xbf16>
    %14 = vector.shape_cast %13 : vector<1x8x8x4xbf16> to vector<8x8x4xbf16>
    %15 = vector.shape_cast %14 : vector<8x8x4xbf16> to vector<64x4xbf16>
    %c0_11 = arith.constant 0 : index
    %c1_12 = arith.constant 1 : index
    %c0_13 = arith.constant 0 : index
    %c0_14 = arith.constant 0 : index
    %16 = vector.load %arg4[%c0_11, %c1_12, %c0_13, %c0_14] : memref<3x3x4x8xbf16, #tpu.memory_space<vmem>>, vector<1x1x4x8xbf16>
    %17 = vector.shape_cast %16 : vector<1x1x4x8xbf16> to vector<4x8xbf16>
    %cst_15 = arith.constant dense<0.000000e+00> : vector<64x8xf32>
    %18 = tpu.matmul %15, %17, %cst_15 {dimension_numbers = #tpu.dot_dimension_numbers<[1], [0], [0], [1], [0, 0, 1, 1], [], []>} : vector<64x4xbf16>, vector<4x8xbf16>, vector<64x8xf32> -> vector<64x8xf32>
    %c0_16 = arith.constant 0 : index
    %c0_17 = arith.constant 0 : index
    %19 = vector.load %arg7[%c0_16, %c0_17] : memref<64x8xf32, #tpu.memory_space<vmem>>, vector<64x8xf32>
    %20 = arith.addf %19, %18 : vector<64x8xf32>
    %c0_18 = arith.constant 0 : index
    %c0_19 = arith.constant 0 : index
    %21 = vector.load %arg7[%c0_18, %c0_19] : memref<64x8xf32, #tpu.memory_space<vmem>>, vector<64x8xf32>
    tpu.vector_store %arg7[%c0_18, %c0_19], %20 {strides = array<i32>} : memref<64x8xf32, #tpu.memory_space<vmem>>, vector<64x8xf32>,
    %c0_i32_20 = arith.constant 0 : i32
    %22 = arith.addi %1, %c0_i32_20 : i32
    %c0_21 = arith.constant 0 : index
    %23 = arith.index_cast %22 : i32 to index
    %c1_22 = arith.constant 1 : index
    %c0_23 = arith.constant 0 : index
    %24 = vector.load %arg3[%c0_21, %23, %c1_22, %c0_23] : memref<4x9x9x4xbf16, #tpu.memory_space<vmem>>, vector<1x8x8x4xbf16>
    %25 = vector.shape_cast %24 : vector<1x8x8x4xbf16> to vector<8x8x4xbf16>
    %26 = vector.shape_cast %25 : vector<8x8x4xbf16> to vector<64x4xbf16>
    %c0_24 = arith.constant 0 : index
    %c2 = arith.constant 2 : index
    %c0_25 = arith.constant 0 : index
    %c0_26 = arith.constant 0 : index
    %27 = vector.load %arg4[%c0_24, %c2, %c0_25, %c0_26] : memref<3x3x4x8xbf16, #tpu.memory_space<vmem>>, vector<1x1x4x8xbf16>
    %28 = vector.shape_cast %27 : vector<1x1x4x8xbf16> to vector<4x8xbf16>
    %cst_27 = arith.constant dense<0.000000e+00> : vector<64x8xf32>
    %29 = tpu.matmul %26, %28, %cst_27 {dimension_numbers = #tpu.dot_dimension_numbers<[1], [0], [0], [1], [0, 0, 1, 1], [], []>} : vector<64x4xbf16>, vector<4x8xbf16>, vector<64x8xf32> -> vector<64x8xf32>
    %c0_28 = arith.constant 0 : index
    %c0_29 = arith.constant 0 : index
    %30 = vector.load %arg7[%c0_28, %c0_29] : memref<64x8xf32, #tpu.memory_space<vmem>>, vector<64x8xf32>
    %31 = arith.addf %30, %29 : vector<64x8xf32>
    %c0_30 = arith.constant 0 : index
    %c0_31 = arith.constant 0 : index
    %32 = vector.load %arg7[%c0_30, %c0_31] : memref<64x8xf32, #tpu.memory_space<vmem>>, vector<64x8xf32>
    tpu.vector_store %arg7[%c0_30, %c0_31], %31 {strides = array<i32>} : memref<64x8xf32, #tpu.memory_space<vmem>>, vector<64x8xf32>,
    %c0_i32_32 = arith.constant 0 : i32
    %33 = arith.addi %1, %c0_i32_32 : i32
    %c2_33 = arith.constant 2 : index
    %34 = arith.index_cast %33 : i32 to index
    %c0_34 = arith.constant 0 : index
    %c0_35 = arith.constant 0 : index
    %35 = vector.load %arg3[%c2_33, %34, %c0_34, %c0_35] : memref<4x9x9x4xbf16, #tpu.memory_space<vmem>>, vector<1x8x8x4xbf16>
    %36 = vector.shape_cast %35 : vector<1x8x8x4xbf16> to vector<8x8x4xbf16>
    %37 = vector.shape_cast %36 : vector<8x8x4xbf16> to vector<64x4xbf16>
    %c1_36 = arith.constant 1 : index
    %c0_37 = arith.constant 0 : index
    %c0_38 = arith.constant 0 : index
    %c0_39 = arith.constant 0 : index
    %38 = vector.load %arg4[%c1_36, %c0_37, %c0_38, %c0_39] : memref<3x3x4x8xbf16, #tpu.memory_space<vmem>>, vector<1x1x4x8xbf16>
    %39 = vector.shape_cast %38 : vector<1x1x4x8xbf16> to vector<4x8xbf16>
    %cst_40 = arith.constant dense<0.000000e+00> : vector<64x8xf32>
    %40 = tpu.matmul %37, %39, %cst_40 {dimension_numbers = #tpu.dot_dimension_numbers<[1], [0], [0], [1], [0, 0, 1, 1], [], []>} : vector<64x4xbf16>, vector<4x8xbf16>, vector<64x8xf32> -> vector<64x8xf32>
    %c0_41 = arith.constant 0 : index
    %c0_42 = arith.constant 0 : index
    %41 = vector.load %arg7[%c0_41, %c0_42] : memref<64x8xf32, #tpu.memory_space<vmem>>, vector<64x8xf32>
    %42 = arith.addf %41, %40 : vector<64x8xf32>
    %c0_43 = arith.constant 0 : index
    %c0_44 = arith.constant 0 : index
    %43 = vector.load %arg7[%c0_43, %c0_44] : memref<64x8xf32, #tpu.memory_space<vmem>>, vector<64x8xf32>
    tpu.vector_store %arg7[%c0_43, %c0_44], %42 {strides = array<i32>} : memref<64x8xf32, #tpu.memory_space<vmem>>, vector<64x8xf32>,
    %c0_i32_45 = arith.constant 0 : i32
    %44 = arith.addi %1, %c0_i32_45 : i32
    %c3 = arith.constant 3 : index
    %45 = arith.index_cast %44 : i32 to index
    %c0_46 = arith.constant 0 : index
    %c0_47 = arith.constant 0 : index
    %46 = vector.load %arg3[%c3, %45, %c0_46, %c0_47] : memref<4x9x9x4xbf16, #tpu.memory_space<vmem>>, vector<1x8x8x4xbf16>
    %47 = vector.shape_cast %46 : vector<1x8x8x4xbf16> to vector<8x8x4xbf16>
    %48 = vector.shape_cast %47 : vector<8x8x4xbf16> to vector<64x4xbf16>
    %c1_48 = arith.constant 1 : index
    %c1_49 = arith.constant 1 : index
    %c0_50 = arith.constant 0 : index
    %c0_51 = arith.constant 0 : index
    %49 = vector.load %arg4[%c1_48, %c1_49, %c0_50, %c0_51] : memref<3x3x4x8xbf16, #tpu.memory_space<vmem>>, vector<1x1x4x8xbf16>
    %50 = vector.shape_cast %49 : vector<1x1x4x8xbf16> to vector<4x8xbf16>
    %cst_52 = arith.constant dense<0.000000e+00> : vector<64x8xf32>
    %51 = tpu.matmul %48, %50, %cst_52 {dimension_numbers = #tpu.dot_dimension_numbers<[1], [0], [0], [1], [0, 0, 1, 1], [], []>} : vector<64x4xbf16>, vector<4x8xbf16>, vector<64x8xf32> -> vector<64x8xf32>
    %c0_53 = arith.constant 0 : index
    %c0_54 = arith.constant 0 : index
    %52 = vector.load %arg7[%c0_53, %c0_54] : memref<64x8xf32, #tpu.memory_space<vmem>>, vector<64x8xf32>
    %53 = arith.addf %52, %51 : vector<64x8xf32>
    %c0_55 = arith.constant 0 : index
    %c0_56 = arith.constant 0 : index
    %54 = vector.load %arg7[%c0_55, %c0_56] : memref<64x8xf32, #tpu.memory_space<vmem>>, vector<64x8xf32>
    tpu.vector_store %arg7[%c0_55, %c0_56], %53 {strides = array<i32>} : memref<64x8xf32, #tpu.memory_space<vmem>>, vector<64x8xf32>,
    %c0_i32_57 = arith.constant 0 : i32
    %55 = arith.addi %1, %c0_i32_57 : i32
    %c2_58 = arith.constant 2 : index
    %56 = arith.index_cast %55 : i32 to index
    %c1_59 = arith.constant 1 : index
    %c0_60 = arith.constant 0 : index
    %57 = vector.load %arg3[%c2_58, %56, %c1_59, %c0_60] : memref<4x9x9x4xbf16, #tpu.memory_space<vmem>>, vector<1x8x8x4xbf16>
    %58 = vector.shape_cast %57 : vector<1x8x8x4xbf16> to vector<8x8x4xbf16>
    %59 = vector.shape_cast %58 : vector<8x8x4xbf16> to vector<64x4xbf16>
    %c1_61 = arith.constant 1 : index
    %c2_62 = arith.constant 2 : index
    %c0_63 = arith.constant 0 : index
    %c0_64 = arith.constant 0 : index
    %60 = vector.load %arg4[%c1_61, %c2_62, %c0_63, %c0_64] : memref<3x3x4x8xbf16, #tpu.memory_space<vmem>>, vector<1x1x4x8xbf16>
    %61 = vector.shape_cast %60 : vector<1x1x4x8xbf16> to vector<4x8xbf16>
    %cst_65 = arith.constant dense<0.000000e+00> : vector<64x8xf32>
    %62 = tpu.matmul %59, %61, %cst_65 {dimension_numbers = #tpu.dot_dimension_numbers<[1], [0], [0], [1], [0, 0, 1, 1], [], []>} : vector<64x4xbf16>, vector<4x8xbf16>, vector<64x8xf32> -> vector<64x8xf32>
    %c0_66 = arith.constant 0 : index
    %c0_67 = arith.constant 0 : index
    %63 = vector.load %arg7[%c0_66, %c0_67] : memref<64x8xf32, #tpu.memory_space<vmem>>, vector<64x8xf32>
    %64 = arith.addf %63, %62 : vector<64x8xf32>
    %c0_68 = arith.constant 0 : index
    %c0_69 = arith.constant 0 : index
    %65 = vector.load %arg7[%c0_68, %c0_69] : memref<64x8xf32, #tpu.memory_space<vmem>>, vector<64x8xf32>
    tpu.vector_store %arg7[%c0_68, %c0_69], %64 {strides = array<i32>} : memref<64x8xf32, #tpu.memory_space<vmem>>, vector<64x8xf32>,
    %c1_i32 = arith.constant 1 : i32
    %66 = arith.addi %1, %c1_i32 : i32
    %c0_70 = arith.constant 0 : index
    %67 = arith.index_cast %66 : i32 to index
    %c0_71 = arith.constant 0 : index
    %c0_72 = arith.constant 0 : index
    %68 = vector.load %arg3[%c0_70, %67, %c0_71, %c0_72] : memref<4x9x9x4xbf16, #tpu.memory_space<vmem>>, vector<1x8x8x4xbf16>
    %69 = vector.shape_cast %68 : vector<1x8x8x4xbf16> to vector<8x8x4xbf16>
    %70 = vector.shape_cast %69 : vector<8x8x4xbf16> to vector<64x4xbf16>
    %c2_73 = arith.constant 2 : index
    %c0_74 = arith.constant 0 : index
    %c0_75 = arith.constant 0 : index
    %c0_76 = arith.constant 0 : index
    %71 = vector.load %arg4[%c2_73, %c0_74, %c0_75, %c0_76] : memref<3x3x4x8xbf16, #tpu.memory_space<vmem>>, vector<1x1x4x8xbf16>
    %72 = vector.shape_cast %71 : vector<1x1x4x8xbf16> to vector<4x8xbf16>
    %cst_77 = arith.constant dense<0.000000e+00> : vector<64x8xf32>
    %73 = tpu.matmul %70, %72, %cst_77 {dimension_numbers = #tpu.dot_dimension_numbers<[1], [0], [0], [1], [0, 0, 1, 1], [], []>} : vector<64x4xbf16>, vector<4x8xbf16>, vector<64x8xf32> -> vector<64x8xf32>
    %c0_78 = arith.constant 0 : index
    %c0_79 = arith.constant 0 : index
    %74 = vector.load %arg7[%c0_78, %c0_79] : memref<64x8xf32, #tpu.memory_space<vmem>>, vector<64x8xf32>
    %75 = arith.addf %74, %73 : vector<64x8xf32>
    %c0_80 = arith.constant 0 : index
    %c0_81 = arith.constant 0 : index
    %76 = vector.load %arg7[%c0_80, %c0_81] : memref<64x8xf32, #tpu.memory_space<vmem>>, vector<64x8xf32>
    tpu.vector_store %arg7[%c0_80, %c0_81], %75 {strides = array<i32>} : memref<64x8xf32, #tpu.memory_space<vmem>>, vector<64x8xf32>,
    %c1_i32_82 = arith.constant 1 : i32
    %77 = arith.addi %1, %c1_i32_82 : i32
    %c1_83 = arith.constant 1 : index
    %78 = arith.index_cast %77 : i32 to index
    %c0_84 = arith.constant 0 : index
    %c0_85 = arith.constant 0 : index
    %79 = vector.load %arg3[%c1_83, %78, %c0_84, %c0_85] : memref<4x9x9x4xbf16, #tpu.memory_space<vmem>>, vector<1x8x8x4xbf16>
    %80 = vector.shape_cast %79 : vector<1x8x8x4xbf16> to vector<8x8x4xbf16>
    %81 = vector.shape_cast %80 : vector<8x8x4xbf16> to vector<64x4xbf16>
    %c2_86 = arith.constant 2 : index
    %c1_87 = arith.constant 1 : index
    %c0_88 = arith.constant 0 : index
    %c0_89 = arith.constant 0 : index
    %82 = vector.load %arg4[%c2_86, %c1_87, %c0_88, %c0_89] : memref<3x3x4x8xbf16, #tpu.memory_space<vmem>>, vector<1x1x4x8xbf16>
    %83 = vector.shape_cast %82 : vector<1x1x4x8xbf16> to vector<4x8xbf16>
    %cst_90 = arith.constant dense<0.000000e+00> : vector<64x8xf32>
    %84 = tpu.matmul %81, %83, %cst_90 {dimension_numbers = #tpu.dot_dimension_numbers<[1], [0], [0], [1], [0, 0, 1, 1], [], []>} : vector<64x4xbf16>, vector<4x8xbf16>, vector<64x8xf32> -> vector<64x8xf32>
    %c0_91 = arith.constant 0 : index
    %c0_92 = arith.constant 0 : index
    %85 = vector.load %arg7[%c0_91, %c0_92] : memref<64x8xf32, #tpu.memory_space<vmem>>, vector<64x8xf32>
    %86 = arith.addf %85, %84 : vector<64x8xf32>
    %c0_93 = arith.constant 0 : index
    %c0_94 = arith.constant 0 : index
    %87 = vector.load %arg7[%c0_93, %c0_94] : memref<64x8xf32, #tpu.memory_space<vmem>>, vector<64x8xf32>
    tpu.vector_store %arg7[%c0_93, %c0_94], %86 {strides = array<i32>} : memref<64x8xf32, #tpu.memory_space<vmem>>, vector<64x8xf32>,
    %c1_i32_95 = arith.constant 1 : i32
    %88 = arith.addi %1, %c1_i32_95 : i32
    %c0_96 = arith.constant 0 : index
    %89 = arith.index_cast %88 : i32 to index
    %c1_97 = arith.constant 1 : index
    %c0_98 = arith.constant 0 : index
    %90 = vector.load %arg3[%c0_96, %89, %c1_97, %c0_98] : memref<4x9x9x4xbf16, #tpu.memory_space<vmem>>, vector<1x8x8x4xbf16>
    %91 = vector.shape_cast %90 : vector<1x8x8x4xbf16> to vector<8x8x4xbf16>
    %92 = vector.shape_cast %91 : vector<8x8x4xbf16> to vector<64x4xbf16>
    %c2_99 = arith.constant 2 : index
    %c2_100 = arith.constant 2 : index
    %c0_101 = arith.constant 0 : index
    %c0_102 = arith.constant 0 : index
    %93 = vector.load %arg4[%c2_99, %c2_100, %c0_101, %c0_102] : memref<3x3x4x8xbf16, #tpu.memory_space<vmem>>, vector<1x1x4x8xbf16>
    %94 = vector.shape_cast %93 : vector<1x1x4x8xbf16> to vector<4x8xbf16>
    %cst_103 = arith.constant dense<0.000000e+00> : vector<64x8xf32>
    %95 = tpu.matmul %92, %94, %cst_103 {dimension_numbers = #tpu.dot_dimension_numbers<[1], [0], [0], [1], [0, 0, 1, 1], [], []>} : vector<64x4xbf16>, vector<4x8xbf16>, vector<64x8xf32> -> vector<64x8xf32>
    %c0_104 = arith.constant 0 : index
    %c0_105 = arith.constant 0 : index
    %96 = vector.load %arg7[%c0_104, %c0_105] : memref<64x8xf32, #tpu.memory_space<vmem>>, vector<64x8xf32>
    %97 = arith.addf %96, %95 : vector<64x8xf32>
    %c0_106 = arith.constant 0 : index
    %c0_107 = arith.constant 0 : index
    %98 = vector.load %arg7[%c0_106, %c0_107] : memref<64x8xf32, #tpu.memory_space<vmem>>, vector<64x8xf32>
    tpu.vector_store %arg7[%c0_106, %c0_107], %97 {strides = array<i32>} : memref<64x8xf32, #tpu.memory_space<vmem>>, vector<64x8xf32>,
    %c0_108 = arith.constant 0 : index
    %c0_109 = arith.constant 0 : index
    %99 = vector.load %arg7[%c0_108, %c0_109] : memref<64x8xf32, #tpu.memory_space<vmem>>, vector<64x8xf32>
    %c0_110 = arith.constant 0 : index
    %c0_111 = arith.constant 0 : index
    %100 = vector.load %arg5[%c0_110, %c0_111] : memref<1x8xf32, #tpu.memory_space<vmem>>, vector<1x8xf32>
    %101 = vector.broadcast %100 : vector<1x8xf32> to vector<64x8xf32>
    %102 = arith.addf %99, %101 : vector<64x8xf32>
    %103 = vector.shape_cast %102 : vector<64x8xf32> to vector<8x8x8xf32>
    %c0_112 = arith.constant 0 : index
    %c0_113 = arith.constant 0 : index
    %c0_114 = arith.constant 0 : index
    %c0_115 = arith.constant 0 : index
    %104 = vector.load %arg6[%c0_112, %c0_113, %c0_114, %c0_115] : memref<1x8x8x8xf32, #tpu.memory_space<vmem>>, vector<1x8x8x8xf32>
    %105 = vector.shape_cast %104 : vector<1x8x8x8xf32> to vector<8x8x8xf32>
    %106 = vector.shape_cast %103 : vector<8x8x8xf32> to vector<1x8x8x8xf32>
    tpu.vector_store %arg6[%c0_112, %c0_113, %c0_114, %c0_115], %106 {strides = array<i32>} : memref<1x8x8x8xf32, #tpu.memory_space<vmem>>, vector<1x8x8x8xf32>,
    return
  }
  func.func @transform_0(%arg0: i32, %arg1: i32, %arg2: i32) -> (i32, i32, i32, i32) {
    %c0_i32 = arith.constant 0 : i32
    %c0_i32_0 = arith.constant 0 : i32
    %c0_i32_1 = arith.constant 0 : i32
    %c0_i32_2 = arith.constant 0 : i32
    return %arg0, %c0_i32, %c0_i32_0, %c0_i32_1 : i32, i32, i32, i32
  }
  func.func @transform_1(%arg0: i32, %arg1: i32, %arg2: i32) -> (i32, i32, i32, i32) {
    %c0_i32 = arith.constant 0 : i32
    %c0_i32_0 = arith.constant 0 : i32
    %c0_i32_1 = arith.constant 0 : i32
    %c0_i32_2 = arith.constant 0 : i32
    return %c0_i32, %c0_i32_0, %c0_i32_1, %arg1 : i32, i32, i32, i32
  }
  func.func @transform_2(%arg0: i32, %arg1: i32, %arg2: i32) -> (i32, i32) {
    %c0_i32 = arith.constant 0 : i32
    %c0_i32_0 = arith.constant 0 : i32
    return %c0_i32, %arg1 : i32, i32
  }
  func.func @transform_3(%arg0: i32, %arg1: i32, %arg2: i32) -> (i32, i32, i32, i32) {
    %c0_i32 = arith.constant 0 : i32
    %c0_i32_0 = arith.constant 0 : i32
    return %arg0, %arg2, %c0_i32, %arg1 : i32, i32, i32, i32
  }
}

module attributes {stable_mosaic.version = 11 : i64} {
  func.func @_conv3x3_s2_kernel(%arg0: i32, %arg1: i32, %arg2: i32, %arg3: memref<4x5x9x8xbf16, #tpu.memory_space<vmem>>, %arg4: memref<3x3x8x8xbf16, #tpu.memory_space<vmem>>, %arg5: memref<1x8xf32, #tpu.memory_space<vmem>>, %arg6: memref<1x4x8x8xf32, #tpu.memory_space<vmem>>, %arg7: memref<32x8xf32, #tpu.memory_space<vmem>>) attributes {dimension_semantics = [#tpu.dimension_semantics<parallel>, #tpu.dimension_semantics<parallel>, #tpu.dimension_semantics<parallel>], iteration_bounds = array<i64: 2, 1, 1>, scalar_prefetch = 0 : i64, scratch_operands = 1 : i64, tpu.core_type = #tpu.core_type<tc>, window_params = [{transform_indices = @transform_0, window_bounds = array<i64: 4, 5, 9, 8>}, {transform_indices = @transform_1, window_bounds = array<i64: 3, 3, 8, 8>}, {transform_indices = @transform_2, window_bounds = array<i64: 1, 8>}, {transform_indices = @transform_3, window_bounds = array<i64: 1, 4, 8, 8>}]} {
    %c4_i32 = arith.constant 4 : i32
    %0 = arith.muli %arg2, %c4_i32 : i32
    %c0_i32 = arith.constant 0 : i32
    %1 = arith.addi %0, %c0_i32 : i32
    %c0 = arith.constant 0 : index
    %2 = arith.index_cast %1 : i32 to index
    %c0_0 = arith.constant 0 : index
    %c0_1 = arith.constant 0 : index
    %3 = vector.load %arg3[%c0, %2, %c0_0, %c0_1] : memref<4x5x9x8xbf16, #tpu.memory_space<vmem>>, vector<1x4x8x8xbf16>
    %4 = vector.shape_cast %3 : vector<1x4x8x8xbf16> to vector<4x8x8xbf16>
    %5 = vector.shape_cast %4 : vector<4x8x8xbf16> to vector<32x8xbf16>
    %c0_2 = arith.constant 0 : index
    %c0_3 = arith.constant 0 : index
    %c0_4 = arith.constant 0 : index
    %c0_5 = arith.constant 0 : index
    %6 = vector.load %arg4[%c0_2, %c0_3, %c0_4, %c0_5] : memref<3x3x8x8xbf16, #tpu.memory_space<vmem>>, vector<1x1x8x8xbf16>
    %7 = vector.shape_cast %6 : vector<1x1x8x8xbf16> to vector<8x8xbf16>
    %cst = arith.constant dense<0.000000e+00> : vector<32x8xf32>
    %8 = tpu.matmul %5, %7, %cst {dimension_numbers = #tpu.dot_dimension_numbers<[1], [0], [0], [1], [0, 0, 1, 1], [], []>} : vector<32x8xbf16>, vector<8x8xbf16>, vector<32x8xf32> -> vector<32x8xf32>
    %c0_6 = arith.constant 0 : index
    %c0_7 = arith.constant 0 : index
    %9 = vector.load %arg7[%c0_6, %c0_7] : memref<32x8xf32, #tpu.memory_space<vmem>>, vector<32x8xf32>
    tpu.vector_store %arg7[%c0_6, %c0_7], %8 {strides = array<i32>} : memref<32x8xf32, #tpu.memory_space<vmem>>, vector<32x8xf32>,
    %c0_i32_8 = arith.constant 0 : i32
    %10 = arith.addi %0, %c0_i32_8 : i32
    %c1 = arith.constant 1 : index
    %11 = arith.index_cast %10 : i32 to index
    %c0_9 = arith.constant 0 : index
    %c0_10 = arith.constant 0 : index
    %12 = vector.load %arg3[%c1, %11, %c0_9, %c0_10] : memref<4x5x9x8xbf16, #tpu.memory_space<vmem>>, vector<1x4x8x8xbf16>
    %13 = vector.shape_cast %12 : vector<1x4x8x8xbf16> to vector<4x8x8xbf16>
    %14 = vector.shape_cast %13 : vector<4x8x8xbf16> to vector<32x8xbf16>
    %c0_11 = arith.constant 0 : index
    %c1_12 = arith.constant 1 : index
    %c0_13 = arith.constant 0 : index
    %c0_14 = arith.constant 0 : index
    %15 = vector.load %arg4[%c0_11, %c1_12, %c0_13, %c0_14] : memref<3x3x8x8xbf16, #tpu.memory_space<vmem>>, vector<1x1x8x8xbf16>
    %16 = vector.shape_cast %15 : vector<1x1x8x8xbf16> to vector<8x8xbf16>
    %cst_15 = arith.constant dense<0.000000e+00> : vector<32x8xf32>
    %17 = tpu.matmul %14, %16, %cst_15 {dimension_numbers = #tpu.dot_dimension_numbers<[1], [0], [0], [1], [0, 0, 1, 1], [], []>} : vector<32x8xbf16>, vector<8x8xbf16>, vector<32x8xf32> -> vector<32x8xf32>
    %c0_16 = arith.constant 0 : index
    %c0_17 = arith.constant 0 : index
    %18 = vector.load %arg7[%c0_16, %c0_17] : memref<32x8xf32, #tpu.memory_space<vmem>>, vector<32x8xf32>
    %19 = arith.addf %18, %17 : vector<32x8xf32>
    %c0_18 = arith.constant 0 : index
    %c0_19 = arith.constant 0 : index
    %20 = vector.load %arg7[%c0_18, %c0_19] : memref<32x8xf32, #tpu.memory_space<vmem>>, vector<32x8xf32>
    tpu.vector_store %arg7[%c0_18, %c0_19], %19 {strides = array<i32>} : memref<32x8xf32, #tpu.memory_space<vmem>>, vector<32x8xf32>,
    %c0_i32_20 = arith.constant 0 : i32
    %21 = arith.addi %0, %c0_i32_20 : i32
    %c0_21 = arith.constant 0 : index
    %22 = arith.index_cast %21 : i32 to index
    %c1_22 = arith.constant 1 : index
    %c0_23 = arith.constant 0 : index
    %23 = vector.load %arg3[%c0_21, %22, %c1_22, %c0_23] : memref<4x5x9x8xbf16, #tpu.memory_space<vmem>>, vector<1x4x8x8xbf16>
    %24 = vector.shape_cast %23 : vector<1x4x8x8xbf16> to vector<4x8x8xbf16>
    %25 = vector.shape_cast %24 : vector<4x8x8xbf16> to vector<32x8xbf16>
    %c0_24 = arith.constant 0 : index
    %c2 = arith.constant 2 : index
    %c0_25 = arith.constant 0 : index
    %c0_26 = arith.constant 0 : index
    %26 = vector.load %arg4[%c0_24, %c2, %c0_25, %c0_26] : memref<3x3x8x8xbf16, #tpu.memory_space<vmem>>, vector<1x1x8x8xbf16>
    %27 = vector.shape_cast %26 : vector<1x1x8x8xbf16> to vector<8x8xbf16>
    %cst_27 = arith.constant dense<0.000000e+00> : vector<32x8xf32>
    %28 = tpu.matmul %25, %27, %cst_27 {dimension_numbers = #tpu.dot_dimension_numbers<[1], [0], [0], [1], [0, 0, 1, 1], [], []>} : vector<32x8xbf16>, vector<8x8xbf16>, vector<32x8xf32> -> vector<32x8xf32>
    %c0_28 = arith.constant 0 : index
    %c0_29 = arith.constant 0 : index
    %29 = vector.load %arg7[%c0_28, %c0_29] : memref<32x8xf32, #tpu.memory_space<vmem>>, vector<32x8xf32>
    %30 = arith.addf %29, %28 : vector<32x8xf32>
    %c0_30 = arith.constant 0 : index
    %c0_31 = arith.constant 0 : index
    %31 = vector.load %arg7[%c0_30, %c0_31] : memref<32x8xf32, #tpu.memory_space<vmem>>, vector<32x8xf32>
    tpu.vector_store %arg7[%c0_30, %c0_31], %30 {strides = array<i32>} : memref<32x8xf32, #tpu.memory_space<vmem>>, vector<32x8xf32>,
    %c0_i32_32 = arith.constant 0 : i32
    %32 = arith.addi %0, %c0_i32_32 : i32
    %c2_33 = arith.constant 2 : index
    %33 = arith.index_cast %32 : i32 to index
    %c0_34 = arith.constant 0 : index
    %c0_35 = arith.constant 0 : index
    %34 = vector.load %arg3[%c2_33, %33, %c0_34, %c0_35] : memref<4x5x9x8xbf16, #tpu.memory_space<vmem>>, vector<1x4x8x8xbf16>
    %35 = vector.shape_cast %34 : vector<1x4x8x8xbf16> to vector<4x8x8xbf16>
    %36 = vector.shape_cast %35 : vector<4x8x8xbf16> to vector<32x8xbf16>
    %c1_36 = arith.constant 1 : index
    %c0_37 = arith.constant 0 : index
    %c0_38 = arith.constant 0 : index
    %c0_39 = arith.constant 0 : index
    %37 = vector.load %arg4[%c1_36, %c0_37, %c0_38, %c0_39] : memref<3x3x8x8xbf16, #tpu.memory_space<vmem>>, vector<1x1x8x8xbf16>
    %38 = vector.shape_cast %37 : vector<1x1x8x8xbf16> to vector<8x8xbf16>
    %cst_40 = arith.constant dense<0.000000e+00> : vector<32x8xf32>
    %39 = tpu.matmul %36, %38, %cst_40 {dimension_numbers = #tpu.dot_dimension_numbers<[1], [0], [0], [1], [0, 0, 1, 1], [], []>} : vector<32x8xbf16>, vector<8x8xbf16>, vector<32x8xf32> -> vector<32x8xf32>
    %c0_41 = arith.constant 0 : index
    %c0_42 = arith.constant 0 : index
    %40 = vector.load %arg7[%c0_41, %c0_42] : memref<32x8xf32, #tpu.memory_space<vmem>>, vector<32x8xf32>
    %41 = arith.addf %40, %39 : vector<32x8xf32>
    %c0_43 = arith.constant 0 : index
    %c0_44 = arith.constant 0 : index
    %42 = vector.load %arg7[%c0_43, %c0_44] : memref<32x8xf32, #tpu.memory_space<vmem>>, vector<32x8xf32>
    tpu.vector_store %arg7[%c0_43, %c0_44], %41 {strides = array<i32>} : memref<32x8xf32, #tpu.memory_space<vmem>>, vector<32x8xf32>,
    %c0_i32_45 = arith.constant 0 : i32
    %43 = arith.addi %0, %c0_i32_45 : i32
    %c3 = arith.constant 3 : index
    %44 = arith.index_cast %43 : i32 to index
    %c0_46 = arith.constant 0 : index
    %c0_47 = arith.constant 0 : index
    %45 = vector.load %arg3[%c3, %44, %c0_46, %c0_47] : memref<4x5x9x8xbf16, #tpu.memory_space<vmem>>, vector<1x4x8x8xbf16>
    %46 = vector.shape_cast %45 : vector<1x4x8x8xbf16> to vector<4x8x8xbf16>
    %47 = vector.shape_cast %46 : vector<4x8x8xbf16> to vector<32x8xbf16>
    %c1_48 = arith.constant 1 : index
    %c1_49 = arith.constant 1 : index
    %c0_50 = arith.constant 0 : index
    %c0_51 = arith.constant 0 : index
    %48 = vector.load %arg4[%c1_48, %c1_49, %c0_50, %c0_51] : memref<3x3x8x8xbf16, #tpu.memory_space<vmem>>, vector<1x1x8x8xbf16>
    %49 = vector.shape_cast %48 : vector<1x1x8x8xbf16> to vector<8x8xbf16>
    %cst_52 = arith.constant dense<0.000000e+00> : vector<32x8xf32>
    %50 = tpu.matmul %47, %49, %cst_52 {dimension_numbers = #tpu.dot_dimension_numbers<[1], [0], [0], [1], [0, 0, 1, 1], [], []>} : vector<32x8xbf16>, vector<8x8xbf16>, vector<32x8xf32> -> vector<32x8xf32>
    %c0_53 = arith.constant 0 : index
    %c0_54 = arith.constant 0 : index
    %51 = vector.load %arg7[%c0_53, %c0_54] : memref<32x8xf32, #tpu.memory_space<vmem>>, vector<32x8xf32>
    %52 = arith.addf %51, %50 : vector<32x8xf32>
    %c0_55 = arith.constant 0 : index
    %c0_56 = arith.constant 0 : index
    %53 = vector.load %arg7[%c0_55, %c0_56] : memref<32x8xf32, #tpu.memory_space<vmem>>, vector<32x8xf32>
    tpu.vector_store %arg7[%c0_55, %c0_56], %52 {strides = array<i32>} : memref<32x8xf32, #tpu.memory_space<vmem>>, vector<32x8xf32>,
    %c0_i32_57 = arith.constant 0 : i32
    %54 = arith.addi %0, %c0_i32_57 : i32
    %c2_58 = arith.constant 2 : index
    %55 = arith.index_cast %54 : i32 to index
    %c1_59 = arith.constant 1 : index
    %c0_60 = arith.constant 0 : index
    %56 = vector.load %arg3[%c2_58, %55, %c1_59, %c0_60] : memref<4x5x9x8xbf16, #tpu.memory_space<vmem>>, vector<1x4x8x8xbf16>
    %57 = vector.shape_cast %56 : vector<1x4x8x8xbf16> to vector<4x8x8xbf16>
    %58 = vector.shape_cast %57 : vector<4x8x8xbf16> to vector<32x8xbf16>
    %c1_61 = arith.constant 1 : index
    %c2_62 = arith.constant 2 : index
    %c0_63 = arith.constant 0 : index
    %c0_64 = arith.constant 0 : index
    %59 = vector.load %arg4[%c1_61, %c2_62, %c0_63, %c0_64] : memref<3x3x8x8xbf16, #tpu.memory_space<vmem>>, vector<1x1x8x8xbf16>
    %60 = vector.shape_cast %59 : vector<1x1x8x8xbf16> to vector<8x8xbf16>
    %cst_65 = arith.constant dense<0.000000e+00> : vector<32x8xf32>
    %61 = tpu.matmul %58, %60, %cst_65 {dimension_numbers = #tpu.dot_dimension_numbers<[1], [0], [0], [1], [0, 0, 1, 1], [], []>} : vector<32x8xbf16>, vector<8x8xbf16>, vector<32x8xf32> -> vector<32x8xf32>
    %c0_66 = arith.constant 0 : index
    %c0_67 = arith.constant 0 : index
    %62 = vector.load %arg7[%c0_66, %c0_67] : memref<32x8xf32, #tpu.memory_space<vmem>>, vector<32x8xf32>
    %63 = arith.addf %62, %61 : vector<32x8xf32>
    %c0_68 = arith.constant 0 : index
    %c0_69 = arith.constant 0 : index
    %64 = vector.load %arg7[%c0_68, %c0_69] : memref<32x8xf32, #tpu.memory_space<vmem>>, vector<32x8xf32>
    tpu.vector_store %arg7[%c0_68, %c0_69], %63 {strides = array<i32>} : memref<32x8xf32, #tpu.memory_space<vmem>>, vector<32x8xf32>,
    %c1_i32 = arith.constant 1 : i32
    %65 = arith.addi %0, %c1_i32 : i32
    %c0_70 = arith.constant 0 : index
    %66 = arith.index_cast %65 : i32 to index
    %c0_71 = arith.constant 0 : index
    %c0_72 = arith.constant 0 : index
    %67 = vector.load %arg3[%c0_70, %66, %c0_71, %c0_72] : memref<4x5x9x8xbf16, #tpu.memory_space<vmem>>, vector<1x4x8x8xbf16>
    %68 = vector.shape_cast %67 : vector<1x4x8x8xbf16> to vector<4x8x8xbf16>
    %69 = vector.shape_cast %68 : vector<4x8x8xbf16> to vector<32x8xbf16>
    %c2_73 = arith.constant 2 : index
    %c0_74 = arith.constant 0 : index
    %c0_75 = arith.constant 0 : index
    %c0_76 = arith.constant 0 : index
    %70 = vector.load %arg4[%c2_73, %c0_74, %c0_75, %c0_76] : memref<3x3x8x8xbf16, #tpu.memory_space<vmem>>, vector<1x1x8x8xbf16>
    %71 = vector.shape_cast %70 : vector<1x1x8x8xbf16> to vector<8x8xbf16>
    %cst_77 = arith.constant dense<0.000000e+00> : vector<32x8xf32>
    %72 = tpu.matmul %69, %71, %cst_77 {dimension_numbers = #tpu.dot_dimension_numbers<[1], [0], [0], [1], [0, 0, 1, 1], [], []>} : vector<32x8xbf16>, vector<8x8xbf16>, vector<32x8xf32> -> vector<32x8xf32>
    %c0_78 = arith.constant 0 : index
    %c0_79 = arith.constant 0 : index
    %73 = vector.load %arg7[%c0_78, %c0_79] : memref<32x8xf32, #tpu.memory_space<vmem>>, vector<32x8xf32>
    %74 = arith.addf %73, %72 : vector<32x8xf32>
    %c0_80 = arith.constant 0 : index
    %c0_81 = arith.constant 0 : index
    %75 = vector.load %arg7[%c0_80, %c0_81] : memref<32x8xf32, #tpu.memory_space<vmem>>, vector<32x8xf32>
    tpu.vector_store %arg7[%c0_80, %c0_81], %74 {strides = array<i32>} : memref<32x8xf32, #tpu.memory_space<vmem>>, vector<32x8xf32>,
    %c1_i32_82 = arith.constant 1 : i32
    %76 = arith.addi %0, %c1_i32_82 : i32
    %c1_83 = arith.constant 1 : index
    %77 = arith.index_cast %76 : i32 to index
    %c0_84 = arith.constant 0 : index
    %c0_85 = arith.constant 0 : index
    %78 = vector.load %arg3[%c1_83, %77, %c0_84, %c0_85] : memref<4x5x9x8xbf16, #tpu.memory_space<vmem>>, vector<1x4x8x8xbf16>
    %79 = vector.shape_cast %78 : vector<1x4x8x8xbf16> to vector<4x8x8xbf16>
    %80 = vector.shape_cast %79 : vector<4x8x8xbf16> to vector<32x8xbf16>
    %c2_86 = arith.constant 2 : index
    %c1_87 = arith.constant 1 : index
    %c0_88 = arith.constant 0 : index
    %c0_89 = arith.constant 0 : index
    %81 = vector.load %arg4[%c2_86, %c1_87, %c0_88, %c0_89] : memref<3x3x8x8xbf16, #tpu.memory_space<vmem>>, vector<1x1x8x8xbf16>
    %82 = vector.shape_cast %81 : vector<1x1x8x8xbf16> to vector<8x8xbf16>
    %cst_90 = arith.constant dense<0.000000e+00> : vector<32x8xf32>
    %83 = tpu.matmul %80, %82, %cst_90 {dimension_numbers = #tpu.dot_dimension_numbers<[1], [0], [0], [1], [0, 0, 1, 1], [], []>} : vector<32x8xbf16>, vector<8x8xbf16>, vector<32x8xf32> -> vector<32x8xf32>
    %c0_91 = arith.constant 0 : index
    %c0_92 = arith.constant 0 : index
    %84 = vector.load %arg7[%c0_91, %c0_92] : memref<32x8xf32, #tpu.memory_space<vmem>>, vector<32x8xf32>
    %85 = arith.addf %84, %83 : vector<32x8xf32>
    %c0_93 = arith.constant 0 : index
    %c0_94 = arith.constant 0 : index
    %86 = vector.load %arg7[%c0_93, %c0_94] : memref<32x8xf32, #tpu.memory_space<vmem>>, vector<32x8xf32>
    tpu.vector_store %arg7[%c0_93, %c0_94], %85 {strides = array<i32>} : memref<32x8xf32, #tpu.memory_space<vmem>>, vector<32x8xf32>,
    %c1_i32_95 = arith.constant 1 : i32
    %87 = arith.addi %0, %c1_i32_95 : i32
    %c0_96 = arith.constant 0 : index
    %88 = arith.index_cast %87 : i32 to index
    %c1_97 = arith.constant 1 : index
    %c0_98 = arith.constant 0 : index
    %89 = vector.load %arg3[%c0_96, %88, %c1_97, %c0_98] : memref<4x5x9x8xbf16, #tpu.memory_space<vmem>>, vector<1x4x8x8xbf16>
    %90 = vector.shape_cast %89 : vector<1x4x8x8xbf16> to vector<4x8x8xbf16>
    %91 = vector.shape_cast %90 : vector<4x8x8xbf16> to vector<32x8xbf16>
    %c2_99 = arith.constant 2 : index
    %c2_100 = arith.constant 2 : index
    %c0_101 = arith.constant 0 : index
    %c0_102 = arith.constant 0 : index
    %92 = vector.load %arg4[%c2_99, %c2_100, %c0_101, %c0_102] : memref<3x3x8x8xbf16, #tpu.memory_space<vmem>>, vector<1x1x8x8xbf16>
    %93 = vector.shape_cast %92 : vector<1x1x8x8xbf16> to vector<8x8xbf16>
    %cst_103 = arith.constant dense<0.000000e+00> : vector<32x8xf32>
    %94 = tpu.matmul %91, %93, %cst_103 {dimension_numbers = #tpu.dot_dimension_numbers<[1], [0], [0], [1], [0, 0, 1, 1], [], []>} : vector<32x8xbf16>, vector<8x8xbf16>, vector<32x8xf32> -> vector<32x8xf32>
    %c0_104 = arith.constant 0 : index
    %c0_105 = arith.constant 0 : index
    %95 = vector.load %arg7[%c0_104, %c0_105] : memref<32x8xf32, #tpu.memory_space<vmem>>, vector<32x8xf32>
    %96 = arith.addf %95, %94 : vector<32x8xf32>
    %c0_106 = arith.constant 0 : index
    %c0_107 = arith.constant 0 : index
    %97 = vector.load %arg7[%c0_106, %c0_107] : memref<32x8xf32, #tpu.memory_space<vmem>>, vector<32x8xf32>
    tpu.vector_store %arg7[%c0_106, %c0_107], %96 {strides = array<i32>} : memref<32x8xf32, #tpu.memory_space<vmem>>, vector<32x8xf32>,
    %c0_108 = arith.constant 0 : index
    %c0_109 = arith.constant 0 : index
    %98 = vector.load %arg7[%c0_108, %c0_109] : memref<32x8xf32, #tpu.memory_space<vmem>>, vector<32x8xf32>
    %c0_110 = arith.constant 0 : index
    %c0_111 = arith.constant 0 : index
    %99 = vector.load %arg5[%c0_110, %c0_111] : memref<1x8xf32, #tpu.memory_space<vmem>>, vector<1x8xf32>
    %100 = vector.broadcast %99 : vector<1x8xf32> to vector<32x8xf32>
    %101 = arith.addf %98, %100 : vector<32x8xf32>
    %102 = vector.shape_cast %101 : vector<32x8xf32> to vector<4x8x8xf32>
    %c0_112 = arith.constant 0 : index
    %c0_113 = arith.constant 0 : index
    %c0_114 = arith.constant 0 : index
    %c0_115 = arith.constant 0 : index
    %103 = vector.load %arg6[%c0_112, %c0_113, %c0_114, %c0_115] : memref<1x4x8x8xf32, #tpu.memory_space<vmem>>, vector<1x4x8x8xf32>
    %104 = vector.shape_cast %103 : vector<1x4x8x8xf32> to vector<4x8x8xf32>
    %105 = vector.shape_cast %102 : vector<4x8x8xf32> to vector<1x4x8x8xf32>
    tpu.vector_store %arg6[%c0_112, %c0_113, %c0_114, %c0_115], %105 {strides = array<i32>} : memref<1x4x8x8xf32, #tpu.memory_space<vmem>>, vector<1x4x8x8xf32>,
    return
  }
  func.func @transform_0(%arg0: i32, %arg1: i32, %arg2: i32) -> (i32, i32, i32, i32) {
    %c0_i32 = arith.constant 0 : i32
    %c0_i32_0 = arith.constant 0 : i32
    %c0_i32_1 = arith.constant 0 : i32
    %c0_i32_2 = arith.constant 0 : i32
    return %arg0, %c0_i32, %c0_i32_0, %c0_i32_1 : i32, i32, i32, i32
  }
  func.func @transform_1(%arg0: i32, %arg1: i32, %arg2: i32) -> (i32, i32, i32, i32) {
    %c0_i32 = arith.constant 0 : i32
    %c0_i32_0 = arith.constant 0 : i32
    %c0_i32_1 = arith.constant 0 : i32
    %c0_i32_2 = arith.constant 0 : i32
    return %c0_i32, %c0_i32_0, %c0_i32_1, %arg1 : i32, i32, i32, i32
  }
  func.func @transform_2(%arg0: i32, %arg1: i32, %arg2: i32) -> (i32, i32) {
    %c0_i32 = arith.constant 0 : i32
    %c0_i32_0 = arith.constant 0 : i32
    return %c0_i32, %arg1 : i32, i32
  }
  func.func @transform_3(%arg0: i32, %arg1: i32, %arg2: i32) -> (i32, i32, i32, i32) {
    %c0_i32 = arith.constant 0 : i32
    %c0_i32_0 = arith.constant 0 : i32
    return %arg0, %arg2, %c0_i32, %arg1 : i32, i32, i32, i32
  }
}

</mosaic_0001>

<bundles_post_ra>
// kernel: last_level_p6p7.3
= control target key start
LH: loop header
LB: loop body
LE: loop exit
PB: predicated region body
PF: predicated region fallthrough
CT: control target
= control target key end

     0   :  { %s1633_s12 = smov 0   ;;  %s1635_s13 = smov 0   ;;  %s1851_s0 = inlined_call_operand.vmem [shape: bf16[8,5,9,8], index: 0, kind: input, shape index: {}]   ;;  %s1852_s1 = inlined_call_operand.vmem [shape: bf16[3,3,8,8], index: 1, kind: input, shape index: {}]   ;;  %s1853_s2 = inlined_call_operand.vmem [shape: f32[1,8], index: 2, kind: input, shape index: {}]   ;;  %s1854_s3 = inlined_call_operand.vmem [shape: f32[2,4,8,8], index: 3, kind: output, shape index: {}]  }
   0x1   :  { %s1637_s14 = smov 0  }
   0x2 LB: > { %s32_s15 = sadd.s32 1, %s1607_s13  ;;  %p1373_p0 = scmp.ge.s32.totalorder %s1611_s14, 1  ;;  %s1611_s14 = sphi %s1637_s14, %s13_s14   ;;  %s1607_s13 = sphi %s1635_s13, %s1858_s13   ;;  %s1603_s12 = sphi %s1633_s12, %s1857_s12  }
   0x3   : > { %p34_p1 = scmp.ge.s32.totalorder %s32_s15, 2  ;;  %p179_p2 = scmp.lt.s32.totalorder %s1611_s14, 3 }
   0x5   : > { %s1860_s15 = smov (%p34_p1, %s32_s15), 0  ;;  %p180_p3 = pnand %p1373_p0, %p179_p2 }
   0x6   : > { %v254_v0 = vld [vmem:[%s1852_s1] sm:$0xf] (!%p180_p3)  ;;  %vm272_vm0 = vcmask (!%p180_p3), 1043456   ;;  %s1374_s18 = sshll.u32 (!%p180_p3), %s1603_s12, 2  ;;  %v1386_v2 = vld [vmem:[%s1852_s1 + $0x4] sm:$0xf] (!%p180_p3) }
   0x7   : > { %183 = sbr.rel (%p180_p3) target bundleno = 326 (0x146), region = 32  ;;  %1543 = vmatprep.subr.msk.bf16.mxu0 (!%p180_p3), %vm272_vm0, %v254_v0  ;;  %v274_v1 = vsel (!%p180_p3), %vm272_vm0, %v254_v0, 0  ;;  %p219_p4 = scmp.lt.s32.totalorder (!%p180_p3), %s1374_s18, 7  ;;  %v1391_v3 = vld [vmem:[%s1852_s1 + $0x8] sm:$0xf] (!%p180_p3)  ;;  %1544 = vmatprep.subr.msk.bf16.mxu1 (!%p180_p3), %vm272_vm0, %v1386_v2  ;;  %v355_v4 = vsel (!%p180_p3), %vm272_vm0, %v1386_v2, 0 }
   0x8   : > { %1490 = vmatpush3.bf16.msra.mxu0 (!%p180_p3), %v274_v1  ;;  %1496 = vmatpush3.bf16.msra.mxu1 (!%p180_p3), %v355_v4  ;;  %v1400_v5 = vld [vmem:[%s1852_s1 + $0xc] sm:$0xf] (!%p180_p3)  ;;  %v1422_v6 = vld [vmem:[%s1852_s1 + $0x14] sm:$0xf] (!%p180_p3)  ;;  %vm265_vm1 = vcmask (!%p180_p3), 64512   ;;  %v500_v7 = vsel (!%p180_p3), %vm272_vm0, %v1391_v3, 0 }
   0x9   : > { %1545 = vmatprep.subr.msk.bf16.mxu0 (!%p180_p3), %vm272_vm0, %v1391_v3  ;;  %1546 = vmatprep.subr.msk.bf16.mxu1 (!%p180_p3), %vm272_vm0, %v1400_v5  ;;  %vm426_vm2 = vsmask.f32 (!%p180_p3), 3328  ;;  %vm427_vm3 = vsmask.f32 (!%p180_p3), 7440  ;;  %v589_v8 = vsel (!%p180_p3), %vm272_vm0, %v1400_v5, 0  ;;  %v1683_v9 = vsel (!%p180_p3), %vm272_vm0, %v1422_v6, 0 }
   0xa   : > { %v1409_v11 = vld [vmem:[%s1852_s1 + $0x10] sm:$0xf] (!%p180_p3)  ;;  %vm1708_vm4 = vmor (!%p180_p3), %vm426_vm2, %vm427_vm3  ;;  %v1431_v46 = vld [vmem:[%s1852_s1 + $0x18] sm:$0xf] (!%p180_p3)  ;;  %p233_p5 = scmp.lt.s32.totalorder (!%p180_p3), %s1603_s12, 1 }
   0xb   : > { %v678_v60 = vsel (!%p180_p3), %vm272_vm0, %v1409_v11, 0  ;;  %v1440_v61 = vld [vmem:[%s1852_s1 + $0x1c] sm:$0xf] (!%p180_p3)  ;;  %v1729_v1 = vsel (!%p180_p3), %vm272_vm0, %v1431_v46, 0 }
   0xe   : > { %s1862_s18 = smov (!%p219_p4, %s1374_s18), 7  ;;  %s1864_s12 = smov (!%p233_p5, %s1603_s12), 1 }
   0xf   : > { %s1552_s27 = smul.u32 40, %s1862_s18  ;;  %s1461_s16 = sshll.u32 %s1864_s12, 5 }
  0x10   : > { %s243_s21 = scalar_lea.vmem %s1854_s3, %s1461_s16 }
  0x11   : > { %s1679_s30 = scalar_lea.vmem %s1851_s0, %s1552_s27 }
  0x12   : > { %v1577_v10 = vld [vmem:[%s1679_s30] ss:$8 sps:$4 sm:$0xff]   ;;  %v1578_v12 = vld [vmem:[%s1679_s30 + $0x10] ss:$8 sps:$4 sm:$0xff]   ;;  %v419_v16 = vld [vmem:[%s1679_s30 + $0x4] sm:$0x1] }
  0x13   : > { %1491 = vmatprep.mubr.msk.bf16.mxu0 %vm265_vm1, %v1577_v10  ;;  %v1579_v13 = vld [vmem:[%s1679_s30 + $0x28] ss:$8 sps:$4 sm:$0xff]   ;;  %v1580_v14 = vld [vmem:[%s1679_s30 + $0x38] ss:$8 sps:$4 sm:$0xff]   ;;  %v421_v18 = vld [vmem:[%s1679_s30 + $0xc] sm:$0x1] }
  0x14   : > { %1492 = vmatmul.mubr.msk.bf16.vlgmr.msra.gmra.mrb[0].mxu0 %vm265_vm1, %v1578_v12  ;;  %1497 = vmatprep.mubr.msk.bf16.mxu1 %vm265_vm1, %v1579_v13  ;;  %v418_v15 = vld [vmem:[%s1679_s30] sm:$0xf]  ;;  %v420_v17 = vld [vmem:[%s1679_s30 + $0x8] sm:$0xf]  ;;  %v439_v21 = vshll.u32 %v419_v16, 16  ;;  %v453_v24 = vshll.u32 %v421_v18, 16 }
  0x15   : > { %1502 = vmatpush3.bf16.msra.mxu0 %v500_v7  ;;  %1498 = vmatmul.mubr.msk.bf16.vlgmr.msra.gmra.mrb[0].mxu1 %vm265_vm1, %v1580_v14  ;;  %v430_v19 = vshrl.u32 %v418_v15, 16  ;;  %v433_v20 = vshll.u32 %v418_v15, 16  ;;  %v444_v22 = vshrl.u32 %v420_v17, 16  ;;  %v447_v23 = vshll.u32 %v420_v17, 16  ;;  %v422_v25 = vld [vmem:[%s1679_s30 + $0x10] sm:$0xf] }
  0x16   : > { %1547 = vmatprep.subr.msk.bf16.mxu0 %vm272_vm0, %v1409_v11  ;;  %v423_v26 = vld [vmem:[%s1679_s30 + $0x14] sm:$0x1]  ;;  %1508 = vmatpush3.bf16.msra.mxu1 %v589_v8  ;;  %v441_v29 = vrot.slane %v439_v21, 5  ;;  %v424_v31 = vld [vmem:[%s1679_s30 + $0x18] sm:$0xf]  ;;  %v455_v33 = vrot.slane %v453_v24, 5 }
  0x17   : > { %v432_v27 = vrot.slane %v430_v19, 4  ;;  %v435_v28 = vrot.slane %v433_v20, 5  ;;  %v446_v30 = vrot.slane %v444_v22, 4  ;;  %1548 = vmatprep.subr.msk.bf16.mxu1 %vm272_vm0, %v1422_v6  ;;  %v449_v32 = vrot.slane %v447_v23, 5  ;;  %v425_v34 = vld [vmem:[%s1679_s30 + $0x1c] sm:$0x1] }
  0x18   : > { %v458_v35 = vshrl.u32 %v422_v25, 16  ;;  %v461_v36 = vshll.u32 %v422_v25, 16  ;;  %v467_v38 = vshll.u32 %v423_v26, 16  ;;  %v472_v39 = vshrl.u32 %v424_v31, 16  ;;  %v1581_v51 = vld [vmem:[%s1679_s30 + $0x50] ss:$8 sps:$4 sm:$0xff]  }
  0x19   : > { %v436_v37 = vor.u32 %v435_v28, %v432_v27  ;;  %v475_v40 = vshll.u32 %v424_v31, 16  ;;  %v450_v42 = vor.u32 %v449_v32, %v446_v30  ;;  %v481_v45 = vshll.u32 %v425_v34, 16  ;;  %1509 = vmatprep.mubr.msk.bf16.mxu1 %vm265_vm1, %v1581_v51  ;;  %v1582_v57 = vld [vmem:[%s1679_s30 + $0x60] ss:$8 sps:$4 sm:$0xff]   ;;  %v1414_v3 = vld [vmem:[%s1679_s30 + $0x50] sm:$0xf] }
  0x1a   : > { %v460_v43 = vrot.slane %v458_v35, 4  ;;  %v463_v44 = vrot.slane %v461_v36, 5  ;;  %v469_v48 = vrot.slane %v467_v38, 5  ;;  %v474_v49 = vrot.slane %v472_v39, 4  ;;  %v1583_v0 = vld [vmem:[%s1679_s30 + $0x78] ss:$8 sps:$4 sm:$0xff]  }
  0x1b   : > { %v437_v47 = vrot.slane %v436_v37, 4  ;;  %v477_v50 = vrot.slane %v475_v40, 5  ;;  %v451_v52 = vrot.slane %v450_v42, 4  ;;  %v483_v54 = vrot.slane %v481_v45, 5  ;;  %v1415_v4 = vld [vmem:[%s1679_s30 + $0x54] sm:$0x1] }
  0x1c   : > { %v464_v53 = vor.u32 %v463_v44, %v460_v43  ;;  %v1416_v5 = vld [vmem:[%s1679_s30 + $0x58] sm:$0xf]  ;;  %v1417_v7 = vld [vmem:[%s1679_s30 + $0x5c] sm:$0x1]  ;;  %v750_v8 = vshrl.u32 %v1414_v3, 16  ;;  %v753_v10 = vshll.u32 %v1414_v3, 16 }
  0x1d   : > { %v442_v55 = vsel %vm1708_vm4, %v437_v47, %v441_v29  ;;  %v478_v56 = vor.u32 %v477_v50, %v474_v49  ;;  %v456_v58 = vsel %vm1708_vm4, %v451_v52, %v455_v33  ;;  %1510 = vmatmul.mubr.msk.bf16.vlgmr.msra.gmra.mrb[4].mxu1 %vm265_vm1, %v1582_v57  ;;  %v759_v11 = vshll.u32 %v1415_v4, 16  ;;  %v1418_v15 = vld [vmem:[%s1679_s30 + $0x60] sm:$0xf]  ;;  %v1419_v19 = vld [vmem:[%s1679_s30 + $0x64] sm:$0x1] }
  0x1e   : > { %v465_v59 = vrot.slane %v464_v53, 4  ;;  %v1392_v62 = vcombine.low %v442_v55, %v456_v58  ;;  %1520 = vmatpush3.bf16.msra.mxu1 %v1683_v9  ;;  %v764_v13 = vshrl.u32 %v1416_v5, 16  ;;  %v767_v14 = vshll.u32 %v1416_v5, 16  ;;  %v1420_v24 = vld [vmem:[%s1679_s30 + $0x68] sm:$0xf] }
  0x1f   : > { %v479_v63 = vrot.slane %v478_v56, 4  ;;  %1550 = vmatprep.subr.msk.bf16.mxu1 %vm272_vm0, %v1440_v61  ;;  %v773_v9 = vshll.u32 %v1417_v7, 16  ;;  %v752_v16 = vrot.slane %v750_v8, 4  ;;  %v755_v17 = vrot.slane %v753_v10, 5  ;;  %v1421_v27 = vld [vmem:[%s1679_s30 + $0x6c] sm:$0x1] }
  0x20   : > { %v470_v2 = vsel %vm1708_vm4, %v465_v59, %v469_v48  ;;  %1503 = vmatprep.mubr.msk.bf16.mxu0 %vm265_vm1, %v1392_v62  ;;  %v761_v18 = vrot.slane %v759_v11, 5  ;;  %v778_v20 = vshrl.u32 %v1418_v15, 16  ;;  %v766_v21 = vrot.slane %v764_v13, 4  ;;  %v1453_v37 = vld [vmem:[%s1852_s1 + $0x20] sm:$0xf] }
  0x21   : > { %v484_v6 = vsel %vm1708_vm4, %v479_v63, %v483_v54  ;;  %v769_v22 = vrot.slane %v767_v14, 5  ;;  %v775_v23 = vrot.slane %v773_v9, 5  ;;  %v781_v25 = vshll.u32 %v1418_v15, 16  ;;  %v1584_v38 = vld [vmem:[%s1679_s30 + $0x88] ss:$8 sps:$4 sm:$0xff]  }
  0x22   : > { %v1393_v12 = vcombine.low %v470_v2, %v484_v6  ;;  %v756_v26 = vor.u32 %v755_v17, %v752_v16  ;;  %v780_v28 = vrot.slane %v778_v20, 4  ;;  %v787_v29 = vshll.u32 %v1419_v19, 16  ;;  %v1585_v45 = vld [vmem:[%s1679_s30 + $0x8] ss:$8 sps:$4 sm:$0xff]   ;;  %v1446_v57 = vld [vmem:[%s1679_s30 + $0xc] sm:$0x1] }
  0x23   : > { %v792_v30 = vshrl.u32 %v1420_v24, 16  ;;  %v770_v31 = vor.u32 %v769_v22, %v766_v21  ;;  %v783_v32 = vrot.slane %v781_v25, 5  ;;  %v795_v33 = vshll.u32 %v1420_v24, 16  ;;  %v1587_v54 = vld [vmem:[%s1679_s30 + $0x30] ss:$8 sps:$4 sm:$0xff]  }
  0x24   : > { %1504 = vmatmul.mubr.msk.bf16.vlgmr.msra.gmra.mrb[4].mxu0 %vm265_vm1, %v1393_v12  ;;  %v801_v34 = vshll.u32 %v1421_v27, 16  ;;  %v757_v35 = vrot.slane %v756_v26, 4  ;;  %v789_v42 = vrot.slane %v787_v29, 5  ;;  %v999_v51 = vsel %vm272_vm0, %v1440_v61, 0  ;;  %v1445_v56 = vld [vmem:[%s1679_s30 + $0x8] sm:$0xf] }
  0x25   : > { %1514 = vmatpush3.bf16.msra.mxu0 %v678_v60  ;;  %1515 = vmatprep.mubr.msk.bf16.mxu0 %vm265_vm1, %v1583_v0  ;;  %v794_v36 = vrot.slane %v792_v30, 4  ;;  %v771_v39 = vrot.slane %v770_v31, 4  ;;  %v784_v40 = vor.u32 %v783_v32, %v780_v28  ;;  %v797_v43 = vrot.slane %v795_v33, 5  ;;  %v1447_v58 = vld [vmem:[%s1679_s30 + $0x10] sm:$0xf] }
  0x26   : > { %1549 = vmatprep.subr.msk.bf16.mxu0 %vm272_vm0, %v1431_v46  ;;  %v762_v44 = vsel %vm1708_vm4, %v757_v35, %v761_v18  ;;  %v803_v49 = vrot.slane %v801_v34, 5  ;;  %v1141_v55 = vsel %vm272_vm0, %v1453_v37, 0  ;;  %v1448_v59 = vld [vmem:[%s1679_s30 + $0x14] sm:$0x1]  ;;  %v1586_v61 = vld [vmem:[%s1679_s30 + $0x18] ss:$8 sps:$4 sm:$0xff]  }
  0x27   : > { %v776_v46 = vsel %vm1708_vm4, %v771_v39, %v775_v23  ;;  %v785_v47 = vrot.slane %v784_v40, 4  ;;  %v798_v48 = vor.u32 %v797_v43, %v794_v36  ;;  %v1071_v62 = vshrl.u32 %v1445_v56, 16  ;;  %v1449_v2 = vld [vmem:[%s1679_s30 + $0x18] sm:$0xf]  ;;  %v1450_v6 = vld [vmem:[%s1679_s30 + $0x1c] sm:$0x1] }
  0x28   : > { %v1423_v50 = vcombine.low %v762_v44, %v776_v46  ;;  %v1074_v63 = vshll.u32 %v1445_v56, 16  ;;  %v1080_v0 = vshll.u32 %v1446_v57, 16  ;;  %v1088_v4 = vshll.u32 %v1447_v58, 16  ;;  %v1451_v11 = vld [vmem:[%s1679_s30 + $0x20] sm:$0xf] }
  0x29   : > { %v790_v52 = vsel %vm1708_vm4, %v785_v47, %v789_v42  ;;  %v799_v53 = vrot.slane %v798_v48, 4  ;;  %v1094_v5 = vshll.u32 %v1448_v59, 16  ;;  %v1073_v7 = vrot.slane %v1071_v62, 4  ;;  %v1452_v15 = vld [vmem:[%s1679_s30 + $0x24] sm:$0x1] }
  0x2a   : > { %1521 = vmatprep.mubr.msk.bf16.mxu1 %vm265_vm1, %v1423_v50  ;;  %v1076_v8 = vrot.slane %v1074_v63, 5  ;;  %v1082_v10 = vrot.slane %v1080_v0, 5  ;;  %v1099_v12 = vshrl.u32 %v1449_v2, 16  ;;  %v1090_v14 = vrot.slane %v1088_v4, 5  ;;  %v1588_v27 = vld [vmem:[%s1679_s30 + $0x40] ss:$8 sps:$4 sm:$0xff]  }
  0x2b   : > { %v804_v60 = vsel %vm1708_vm4, %v799_v53, %v803_v49  ;;  %v1096_v9 = vrot.slane %v1094_v5, 5  ;;  %v1102_v16 = vshll.u32 %v1449_v2, 16  ;;  %v1108_v19 = vshll.u32 %v1450_v6, 16 }
  0x2c   : > { %1516 = vmatmul.mubr.msk.bf16.vlgmr.msra.gmra.mrb[8].mxu0 %vm265_vm1, %v1584_v38  ;;  %v1424_v3 = vcombine.low %v790_v52, %v804_v60  ;;  %v1077_v17 = vor.u32 %v1076_v8, %v1073_v7  ;;  %v1101_v18 = vrot.slane %v1099_v12, 4  ;;  %v1113_v20 = vshrl.u32 %v1451_v11, 16 }
  0x2d   : > { %1526 = vmatpush3.bf16.msra.mxu0 %v1729_v1  ;;  %1527 = vmatprep.mubr.msk.bf16.mxu0 %vm265_vm1, %v1585_v45  ;;  %v1085_v1 = vshrl.u32 %v1447_v58, 16  ;;  %v1104_v22 = vrot.slane %v1102_v16, 5  ;;  %v1116_v23 = vshll.u32 %v1451_v11, 16  ;;  %v1122_v24 = vshll.u32 %v1452_v15, 16 }
  0x2e   : > { %1551 = vmatprep.subr.msk.bf16.mxu0 %vm272_vm0, %v1453_v37  ;;  %1522 = vmatmul.mubr.msk.bf16.vlgmr.msra.gmra.mrb[8].mxu1 %vm265_vm1, %v1424_v3  ;;  %v1078_v25 = vrot.slane %v1077_v17, 4  ;;  %v1115_v26 = vrot.slane %v1113_v20, 4  ;;  %v1110_v30 = vrot.slane %v1108_v19, 5 }
  0x2f   : > { %v1087_v13 = vrot.slane %v1085_v1, 4  ;;  %1532 = vmatpush3.bf16.msra.mxu1 %v999_v51  ;;  %1533 = vmatprep.mubr.msk.bf16.mxu1 %vm265_vm1, %v1587_v54  ;;  %v1105_v29 = vor.u32 %v1104_v22, %v1101_v18  ;;  %v1118_v31 = vrot.slane %v1116_v23, 5  ;;  %v1124_v36 = vrot.slane %v1122_v24, 5 }
  0x30   : > { %v1083_v32 = vsel %vm1708_vm4, %v1078_v25, %v1082_v10 }
  0x31   : > { %v1091_v21 = vor.u32 %v1090_v14, %v1087_v13  ;;  %v1106_v34 = vrot.slane %v1105_v29, 4  ;;  %v1119_v35 = vor.u32 %v1118_v31, %v1115_v26 }
  0x33   : > { %v1092_v28 = vrot.slane %v1091_v21, 4  ;;  %v1111_v38 = vsel %vm1708_vm4, %v1106_v34, %v1110_v30  ;;  %v1120_v39 = vrot.slane %v1119_v35, 4 }
  0x34   : > { %1528 = vmatmul.mubr.msk.bf16.vlgmr.msra.gmra.mrb[12].mxu0 %vm265_vm1, %v1586_v61 }
  0x35   : > { %1538 = vmatpush3.bf16.msra.mxu0 %v1141_v55  ;;  %v1097_v33 = vsel %vm1708_vm4, %v1092_v28, %v1096_v9  ;;  %v1125_v40 = vsel %vm1708_vm4, %v1120_v39, %v1124_v36 }
  0x36   : > { %v1454_v37 = vcombine.low %v1083_v32, %v1097_v33  ;;  %1534 = vmatmul.mubr.msk.bf16.vlgmr.msra.gmra.mrb[12].mxu1 %vm265_vm1, %v1588_v27  ;;  %v1455_v42 = vcombine.low %v1111_v38, %v1125_v40 }
  0x38   : > { %1539 = vmatprep.mubr.msk.bf16.mxu0 %vm265_vm1, %v1454_v37 }
  0x3c   : > { %1540 = vmatmul.mubr.msk.bf16.vlgmr.msra.gmra.mrb[16].mxu0 %vm265_vm1, %v1455_v42 }
  0xe7   : > { %v1493_v43 = vpop.f32.mrb[0].mxu0 }
  0xe8   : > { %327 = vst.msk [vmem:[#allocation2 + $0x10] sm:$0xff] %vm265_vm1, %v1493_v43  ;;  %v310_v44 = vpop.f32.mrb[1].mxu0  ;;  %v1499_v46 = vpop.f32.mrb[0].mxu1 }
  0xe9   : > { %325 = vst.msk [vmem:[#allocation2] sm:$0xff] %vm265_vm1, %v310_v44  ;;  %v1494_v45 = vpop.f32.mrb[2].mxu0  ;;  %v391_v48 = vpop.f32.mrb[1].mxu1 }
  0xea   : > { %328 = vst.msk [vmem:[#allocation2 + $0x18] sm:$0xff] %vm265_vm1, %v1494_v45  ;;  %v313_v47 = vpop.f32.mrb[3].mxu0  ;;  %v1500_v49 = vpop.f32.mrb[2].mxu1 }
  0xeb   : > { %326 = vst.msk [vmem:[#allocation2 + $0x8] sm:$0xff] %vm265_vm1, %v313_v47  ;;  %v394_v41 = vpop.f32.mrb[3].mxu1 }
  0xef   : > { %v408_v50 = vld [vmem:[#allocation2 + $0x10] sm:$0xff] }
  0xf0   : > { %v412_v51 = vadd.f32 %v1499_v46, %v408_v50  ;;  %v406_v52 = vld [vmem:[#allocation2] sm:$0xff]  ;;  %v1511_v58 = vpop.f32.mrb[4].mxu1 }
  0xf1   : > { %v410_v53 = vadd.f32 %v406_v52, %v391_v48  ;;  %v409_v54 = vld [vmem:[#allocation2 + $0x18] sm:$0xff]  ;;  %v625_v59 = vpop.f32.mrb[5].mxu1 }
  0xf2   : > { %416 = vst.msk [vmem:[#allocation2 + $0x10] sm:$0xff] %vm265_vm1, %v412_v51  ;;  %v413_v55 = vadd.f32 %v1500_v49, %v409_v54  ;;  %v407_v56 = vld [vmem:[#allocation2 + $0x8] sm:$0xff]  ;;  %v1512_v60 = vpop.f32.mrb[6].mxu1 }
  0xf3   : > { %414 = vst.msk [vmem:[#allocation2] sm:$0xff] %vm265_vm1, %v410_v53  ;;  %v411_v57 = vadd.f32 %v407_v56, %v394_v41  ;;  %v628_v61 = vpop.f32.mrb[7].mxu1 }
  0xf4   : > { %417 = vst.msk [vmem:[#allocation2 + $0x18] sm:$0xff] %vm265_vm1, %v413_v55 }
  0xf5   : > { %415 = vst.msk [vmem:[#allocation2 + $0x8] sm:$0xff] %vm265_vm1, %v411_v57 }
  0xf7   : > { %v1505_v62 = vpop.f32.mrb[4].mxu0 }
  0xf8   : > { %v536_v0 = vpop.f32.mrb[5].mxu0 }
  0xf9   : > { %v553_v63 = vld [vmem:[#allocation2 + $0x10] sm:$0xff]  ;;  %v1506_v1 = vpop.f32.mrb[6].mxu0 }
  0xfa   : > { %v557_v2 = vadd.f32 %v1505_v62, %v553_v63  ;;  %v551_v3 = vld [vmem:[#allocation2] sm:$0xff]  ;;  %v539_v6 = vpop.f32.mrb[7].mxu0 }
  0xfb   : > { %v555_v4 = vadd.f32 %v551_v3, %v536_v0  ;;  %v554_v5 = vld [vmem:[#allocation2 + $0x18] sm:$0xff] }
  0xfc   : > { %561 = vst.msk [vmem:[#allocation2 + $0x10] sm:$0xff] %vm265_vm1, %v557_v2  ;;  %v558_v7 = vadd.f32 %v1506_v1, %v554_v5  ;;  %v552_v8 = vld [vmem:[#allocation2 + $0x8] sm:$0xff] }
  0xfd   : > { %559 = vst.msk [vmem:[#allocation2] sm:$0xff] %vm265_vm1, %v555_v4  ;;  %v556_v10 = vadd.f32 %v552_v8, %v539_v6 }
  0xfe   : > { %562 = vst.msk [vmem:[#allocation2 + $0x18] sm:$0xff] %vm265_vm1, %v558_v7 }
  0xff   : > { %560 = vst.msk [vmem:[#allocation2 + $0x8] sm:$0xff] %vm265_vm1, %v556_v10  ;;  %v1517_v11 = vpop.f32.mrb[8].mxu0 }
 0x100   : > { %v714_v12 = vpop.f32.mrb[9].mxu0 }
 0x101   : > { %v1518_v13 = vpop.f32.mrb[10].mxu0  ;;  %v1523_v19 = vpop.f32.mrb[8].mxu1 }
 0x102   : > { %v717_v9 = vpop.f32.mrb[11].mxu0  ;;  %v856_v22 = vpop.f32.mrb[9].mxu1 }
 0x103   : > { %v642_v14 = vld [vmem:[#allocation2 + $0x10] sm:$0xff]  ;;  %v1524_v24 = vpop.f32.mrb[10].mxu1 }
 0x104   : > { %v646_v15 = vadd.f32 %v1511_v58, %v642_v14  ;;  %v640_v16 = vld [vmem:[#allocation2] sm:$0xff]  ;;  %v859_v25 = vpop.f32.mrb[11].mxu1 }
 0x105   : > { %v644_v17 = vadd.f32 %v640_v16, %v625_v59  ;;  %v643_v18 = vld [vmem:[#allocation2 + $0x18] sm:$0xff] }
 0x106   : > { %650 = vst.msk [vmem:[#allocation2 + $0x10] sm:$0xff] %vm265_vm1, %v646_v15  ;;  %v647_v20 = vadd.f32 %v1512_v60, %v643_v18  ;;  %v641_v21 = vld [vmem:[#allocation2 + $0x8] sm:$0xff] }
 0x107   : > { %648 = vst.msk [vmem:[#allocation2] sm:$0xff] %vm265_vm1, %v644_v17  ;;  %v645_v23 = vadd.f32 %v641_v21, %v628_v61  ;;  %v1529_v26 = vpop.f32.mrb[12].mxu0 }
 0x108   : > { %651 = vst.msk [vmem:[#allocation2 + $0x18] sm:$0xff] %vm265_vm1, %v647_v20  ;;  %v946_v27 = vpop.f32.mrb[13].mxu0 }
 0x109   : > { %649 = vst.msk [vmem:[#allocation2 + $0x8] sm:$0xff] %vm265_vm1, %v645_v23  ;;  %v1530_v28 = vpop.f32.mrb[14].mxu0  ;;  %v1535_v31 = vpop.f32.mrb[12].mxu1 }
 0x10a   : > { %v949_v29 = vpop.f32.mrb[15].mxu0  ;;  %v1035_v34 = vpop.f32.mrb[13].mxu1 }
 0x10b   : > { %v1536_v37 = vpop.f32.mrb[14].mxu1 }
 0x10c   : > { %v1038_v40 = vpop.f32.mrb[15].mxu1 }
 0x10d   : > { %v731_v30 = vld [vmem:[#allocation2 + $0x10] sm:$0xff] }
 0x10e   : > { %v735_v32 = vadd.f32 %v1517_v11, %v731_v30  ;;  %v729_v33 = vld [vmem:[#allocation2] sm:$0xff] }
 0x10f   : > { %v733_v35 = vadd.f32 %v729_v33, %v714_v12  ;;  %v732_v36 = vld [vmem:[#allocation2 + $0x18] sm:$0xff]  ;;  %v1541_v43 = vpop.f32.mrb[16].mxu0 }
 0x110   : > { %739 = vst.msk [vmem:[#allocation2 + $0x10] sm:$0xff] %vm265_vm1, %v735_v32  ;;  %v736_v38 = vadd.f32 %v1518_v13, %v732_v36  ;;  %v730_v39 = vld [vmem:[#allocation2 + $0x8] sm:$0xff]  ;;  %v1177_v44 = vpop.f32.mrb[17].mxu0 }
 0x111   : > { %737 = vst.msk [vmem:[#allocation2] sm:$0xff] %vm265_vm1, %v733_v35  ;;  %v734_v42 = vadd.f32 %v730_v39, %v717_v9  ;;  %v1542_v45 = vpop.f32.mrb[18].mxu0  ;;  %v1458_v9 = vld [vmem:[%s1853_s2] ss:$0 sm:$0xff] }
 0x112   : > { %740 = vst.msk [vmem:[#allocation2 + $0x18] sm:$0xff] %vm265_vm1, %v736_v38  ;;  %v1180_v46 = vpop.f32.mrb[19].mxu0 }
 0x113   : > { %738 = vst.msk [vmem:[#allocation2 + $0x8] sm:$0xff] %vm265_vm1, %v734_v42 }
 0x117   : > { %v873_v47 = vld [vmem:[#allocation2 + $0x10] sm:$0xff] }
 0x118   : > { %v877_v48 = vadd.f32 %v1523_v19, %v873_v47  ;;  %v871_v49 = vld [vmem:[#allocation2] sm:$0xff] }
 0x119   : > { %v875_v41 = vadd.f32 %v871_v49, %v856_v22  ;;  %v874_v50 = vld [vmem:[#allocation2 + $0x18] sm:$0xff] }
 0x11a   : > { %881 = vst.msk [vmem:[#allocation2 + $0x10] sm:$0xff] %vm265_vm1, %v877_v48  ;;  %v878_v51 = vadd.f32 %v1524_v24, %v874_v50  ;;  %v872_v52 = vld [vmem:[#allocation2 + $0x8] sm:$0xff] }
 0x11b   : > { %879 = vst.msk [vmem:[#allocation2] sm:$0xff] %vm265_vm1, %v875_v41  ;;  %v876_v53 = vadd.f32 %v872_v52, %v859_v25 }
 0x11c   : > { %882 = vst.msk [vmem:[#allocation2 + $0x18] sm:$0xff] %vm265_vm1, %v878_v51 }
 0x11d   : > { %880 = vst.msk [vmem:[#allocation2 + $0x8] sm:$0xff] %vm265_vm1, %v876_v53 }
 0x121   : > { %v963_v54 = vld [vmem:[#allocation2 + $0x10] sm:$0xff] }
 0x122   : > { %v967_v55 = vadd.f32 %v1529_v26, %v963_v54  ;;  %v961_v56 = vld [vmem:[#allocation2] sm:$0xff] }
 0x123   : > { %v965_v57 = vadd.f32 %v961_v56, %v946_v27  ;;  %v964_v58 = vld [vmem:[#allocation2 + $0x18] sm:$0xff] }
 0x124   : > { %971 = vst.msk [vmem:[#allocation2 + $0x10] sm:$0xff] %vm265_vm1, %v967_v55  ;;  %v968_v59 = vadd.f32 %v1530_v28, %v964_v58  ;;  %v962_v60 = vld [vmem:[#allocation2 + $0x8] sm:$0xff] }
 0x125   : > { %969 = vst.msk [vmem:[#allocation2] sm:$0xff] %vm265_vm1, %v965_v57  ;;  %v966_v61 = vadd.f32 %v962_v60, %v949_v29 }
 0x126   : > { %972 = vst.msk [vmem:[#allocation2 + $0x18] sm:$0xff] %vm265_vm1, %v968_v59 }
 0x127   : > { %970 = vst.msk [vmem:[#allocation2 + $0x8] sm:$0xff] %vm265_vm1, %v966_v61 }
 0x12b   : > { %v1052_v62 = vld [vmem:[#allocation2 + $0x10] sm:$0xff] }
 0x12c   : > { %v1056_v63 = vadd.f32 %v1535_v31, %v1052_v62  ;;  %v1050_v0 = vld [vmem:[#allocation2] sm:$0xff] }
 0x12d   : > { %v1054_v2 = vadd.f32 %v1050_v0, %v1035_v34  ;;  %v1053_v3 = vld [vmem:[#allocation2 + $0x18] sm:$0xff] }
 0x12e   : > { %1060 = vst.msk [vmem:[#allocation2 + $0x10] sm:$0xff] %vm265_vm1, %v1056_v63  ;;  %v1057_v1 = vadd.f32 %v1536_v37, %v1053_v3  ;;  %v1051_v4 = vld [vmem:[#allocation2 + $0x8] sm:$0xff] }
 0x12f   : > { %1058 = vst.msk [vmem:[#allocation2] sm:$0xff] %vm265_vm1, %v1054_v2  ;;  %v1055_v5 = vadd.f32 %v1051_v4, %v1038_v40 }
 0x130   : > { %1061 = vst.msk [vmem:[#allocation2 + $0x18] sm:$0xff] %vm265_vm1, %v1057_v1 }
 0x131   : > { %1059 = vst.msk [vmem:[#allocation2 + $0x8] sm:$0xff] %vm265_vm1, %v1055_v5 }
 0x135   : > { %v1194_v6 = vld [vmem:[#allocation2 + $0x10] sm:$0xff] }
 0x136   : > { %v1198_v7 = vadd.f32 %v1541_v43, %v1194_v6  ;;  %v1192_v8 = vld [vmem:[#allocation2] sm:$0xff] }
 0x137   : > { %v1196_v10 = vadd.f32 %v1192_v8, %v1177_v44  ;;  %v1195_v11 = vld [vmem:[#allocation2 + $0x18] sm:$0xff] }
 0x138   : > { %1202 = vst.msk [vmem:[#allocation2 + $0x10] sm:$0xff] %vm265_vm1, %v1198_v7  ;;  %v1199_v12 = vadd.f32 %v1542_v45, %v1195_v11  ;;  %v1193_v13 = vld [vmem:[#allocation2 + $0x8] sm:$0xff] }
 0x139   : > { %1200 = vst.msk [vmem:[#allocation2] sm:$0xff] %vm265_vm1, %v1196_v10  ;;  %v1197_v14 = vadd.f32 %v1193_v13, %v1180_v46 }
 0x13a   : > { %1203 = vst.msk [vmem:[#allocation2 + $0x18] sm:$0xff] %vm265_vm1, %v1199_v12 }
 0x13b   : > { %1201 = vst.msk [vmem:[#allocation2 + $0x8] sm:$0xff] %vm265_vm1, %v1197_v14 }
 0x13f   : > { %v1206_v15 = vld [vmem:[#allocation2 + $0x10] sm:$0xff] }
 0x140   : > { %v1217_v16 = vadd.f32 %v1458_v9, %v1206_v15  ;;  %v1204_v17 = vld [vmem:[#allocation2] sm:$0xff] }
 0x141   : > { %v1215_v18 = vadd.f32 %v1458_v9, %v1204_v17  ;;  %v1207_v19 = vld [vmem:[#allocation2 + $0x18] sm:$0xff] }
 0x142   : > { %1221 = vst.msk [vmem:[%s243_s21 + $0x10] sm:$0xff] %vm265_vm1, %v1217_v16  ;;  %v1218_v20 = vadd.f32 %v1458_v9, %v1207_v19  ;;  %v1205_v21 = vld [vmem:[#allocation2 + $0x8] sm:$0xff] }
 0x143   : > { %1219 = vst.msk [vmem:[%s243_s21] sm:$0xff] %vm265_vm1, %v1215_v18  ;;  %v1216_v22 = vadd.f32 %v1458_v9, %v1205_v21 }
 0x144   : > { %1222 = vst.msk [vmem:[%s243_s21 + $0x18] sm:$0xff] %vm265_vm1, %v1218_v20 }
 0x145   : > { %1220 = vst.msk [vmem:[%s243_s21 + $0x8] sm:$0xff] %vm265_vm1, %v1216_v22 }
 0x146 PF: > { %s13_s14 = sadd.s32 1, %s1611_s14   ;;  %s1857_s12 = smov %s1607_s13 }
 0x147   : > { %p10_p6 = scmp.ge.s32.totalorder %s13_s14, 4   ;;  %s1858_s13 = smov %s1860_s15 }
 0x149   :  { %12 = sbr.rel (!%p10_p6) target bundleno = 2 (0x2), region = 82 }

// kernel: last_level_p6p7.2
= control target key start
LH: loop header
LB: loop body
LE: loop exit
PB: predicated region body
PF: predicated region fallthrough
CT: control target
= control target key end

     0   :  { %s2379_s12 = smov 0   ;;  %s2381_s13 = smov 0   ;;  %s2730_s0 = inlined_call_operand.vmem [shape: bf16[8,9,9,4], index: 0, kind: input, shape index: {}]   ;;  %s2731_s1 = inlined_call_operand.vmem [shape: bf16[3,3,4,8], index: 1, kind: input, shape index: {}]   ;;  %s2732_s2 = inlined_call_operand.vmem [shape: f32[1,8], index: 2, kind: input, shape index: {}]   ;;  %s2733_s3 = inlined_call_operand.vmem [shape: f32[2,8,8,8], index: 3, kind: output, shape index: {}]  }
   0x1   :  { %s2383_s14 = smov 0  }
   0x2 LB: > { %s32_s15 = sadd.s32 1, %s2353_s13  ;;  %p1978_p0 = scmp.ge.s32.totalorder %s2357_s14, 1  ;;  %s2357_s14 = sphi %s2383_s14, %s13_s14   ;;  %s2353_s13 = sphi %s2381_s13, %s2737_s13   ;;  %s2349_s12 = sphi %s2379_s12, %s2736_s12  }
   0x3   : > { %p34_p1 = scmp.ge.s32.totalorder %s32_s15, 2  ;;  %p179_p2 = scmp.lt.s32.totalorder %s2357_s14, 3 }
   0x5   : > { %s2739_s15 = smov (%p34_p1, %s32_s15), 0  ;;  %p180_p3 = pnand %p1978_p0, %p179_p2 }
   0x6   : > { %v258_v0 = vld [vmem:[%s2731_s1] sm:$0x3] (!%p180_p3)  ;;  %vm292_vm0 = vcmask (!%p180_p3), 1041408   ;;  %s1979_s18 = sshll.u32 (!%p180_p3), %s2349_s12, 2  ;;  %v1999_v2 = vld [vmem:[%s2731_s1 + $0x2] sm:$0x3] (!%p180_p3) }
   0x7   : > { %183 = sbr.rel (%p180_p3) target bundleno = 335 (0x14f), region = 32  ;;  %2277 = vmatprep.subr.msk.bf16.mxu1 (!%p180_p3), %vm292_vm0, %v258_v0  ;;  %2276 = vmatprep.subr.msk.bf16.mxu0 (!%p180_p3), %vm292_vm0, %v258_v0  ;;  %v294_v1 = vsel (!%p180_p3), %vm292_vm0, %v258_v0, 0  ;;  %p219_p4 = scmp.lt.s32.totalorder (!%p180_p3), %s1979_s18, 7  ;;  %v2008_v3 = vld [vmem:[%s2731_s1 + $0x4] sm:$0x3] (!%p180_p3)  ;;  %vm279_vm1 = vcmask (!%p180_p3), 31744  }
   0x8   : > { %2275 = vmatpush3.bf16.msra.mxu1 (!%p180_p3), %v294_v1  ;;  %2185 = vmatpush3.bf16.msra.mxu0 (!%p180_p3), %v294_v1  ;;  %v2025_v4 = vld [vmem:[%s2731_s1 + $0x6] sm:$0x3] (!%p180_p3)  ;;  %v416_v5 = vsel (!%p180_p3), %vm292_vm0, %v1999_v2, 0  ;;  %v665_v6 = vsel (!%p180_p3), %vm292_vm0, %v2008_v3, 0  ;;  %vm523_vm2 = vsmask.f32 (!%p180_p3), 3328 }
   0x9   : > { %2278 = vmatprep.subr.msk.bf16.mxu1 (!%p180_p3), %vm292_vm0, %v1999_v2  ;;  %2279 = vmatprep.subr.msk.bf16.mxu0 (!%p180_p3), %vm292_vm0, %v2008_v3  ;;  %v802_v7 = vsel (!%p180_p3), %vm292_vm0, %v2025_v4, 0  ;;  %v2042_v11 = vld [vmem:[%s2731_s1 + $0x8] sm:$0x3] (!%p180_p3)  ;;  %vm524_vm3 = vsmask.f32 (!%p180_p3), 7440  ;;  %vm361_vm5 = vcmask (!%p180_p3), 64512  }
   0xa   : > { %v2451_v34 = vld [vmem:[%s2731_s1 + $0xa] sm:$0x3] (!%p180_p3)  ;;  %vm2457_vm4 = vmor (!%p180_p3), %vm523_vm2, %vm524_vm3  ;;  %v939_v52 = vsel (!%p180_p3), %vm292_vm0, %v2042_v11, 0  ;;  %p233_p5 = scmp.lt.s32.totalorder (!%p180_p3), %s2349_s12, 1 }
   0xe   : > { %s2741_s18 = smov (!%p219_p4, %s1979_s18), 7  ;;  %s2743_s12 = smov (!%p233_p5, %s2349_s12), 1 }
   0xf   : > { %s2286_s25 = smul.u32 72, %s2741_s18  ;;  %s2138_s16 = sshll.u32 %s2743_s12, 6 }
  0x10   : > { %s2699_s21 = scalar_lea.vmem %s2733_s3, %s2138_s16 }
  0x11   : > { %s2420_s28 = scalar_lea.vmem %s2730_s0, %s2286_s25 }
  0x12   : > { %v2311_v8 = vld [vmem:[%s2420_s28] ss:$8 sps:$4 sm:$0xff]   ;;  %v2313_v10 = vld [vmem:[%s2420_s28 + $0x10] ss:$8 sps:$4 sm:$0xff]   ;;  %v508_v15 = vld [vmem:[%s2420_s28 + $0x4] sm:$0x1] }
  0x13   : > { %v2312_v9 = vld [vmem:[%s2420_s28 + $0x20] ss:$8 sps:$4 sm:$0xff]   ;;  %2186 = vmatprep.mubr.msk.bf16.mxu0 %vm279_vm1, %v2311_v8  ;;  %v2314_v12 = vld [vmem:[%s2420_s28 + $0x30] ss:$8 sps:$4 sm:$0xff]   ;;  %v510_v18 = vld [vmem:[%s2420_s28 + $0xc] sm:$0x1] }
  0x14   : > { %2190 = vmatprep.mubr.msk.bf16.mxu1 %vm279_vm1, %v2312_v9  ;;  %2187 = vmatmul.mubr.msk.bf16.vlgmr.msra.gmra.mrb[0].mxu0 %vm279_vm1, %v2313_v10  ;;  %v2315_v13 = vld [vmem:[%s2420_s28 + $0x48] ss:$8 sps:$4 sm:$0xff]   ;;  %v507_v14 = vld [vmem:[%s2420_s28] sm:$0xf]  ;;  %v536_v21 = vshll.u32 %v508_v15, 16  ;;  %v550_v24 = vshll.u32 %v510_v18, 16 }
  0x15   : > { %2191 = vmatmul.mubr.msk.bf16.vlgmr.msra.gmra.mrb[0].mxu1 %vm279_vm1, %v2314_v12  ;;  %2205 = vmatpush3.bf16.msra.mxu0 %v665_v6  ;;  %v509_v16 = vld [vmem:[%s2420_s28 + $0x8] sm:$0xf]  ;;  %v2316_v17 = vld [vmem:[%s2420_s28 + $0x58] ss:$8 sps:$4 sm:$0xff]   ;;  %v527_v19 = vshrl.u32 %v507_v14, 16  ;;  %v530_v20 = vshll.u32 %v507_v14, 16 }
  0x16   : > { %2195 = vmatpush3.bf16.msra.mxu1 %v416_v5  ;;  %2196 = vmatprep.mubr.msk.bf16.mxu1 %vm279_vm1, %v2315_v13  ;;  %v541_v22 = vshrl.u32 %v509_v16, 16  ;;  %v544_v23 = vshll.u32 %v509_v16, 16  ;;  %v538_v27 = vrot.slane %v536_v21, 5  ;;  %v2317_v29 = vld [vmem:[%s2420_s28 + $0x68] ss:$8 sps:$4 sm:$0xff]   ;;  %v552_v31 = vrot.slane %v550_v24, 5 }
  0x17   : > { %2280 = vmatprep.subr.msk.bf16.mxu1 %vm292_vm0, %v2025_v4  ;;  %2281 = vmatprep.subr.msk.bf16.mxu0 %vm292_vm0, %v2042_v11  ;;  %v529_v25 = vrot.slane %v527_v19, 4  ;;  %v532_v26 = vrot.slane %v530_v20, 5  ;;  %v511_v32 = vld [vmem:[%s2420_s28 + $0x10] sm:$0xf]  ;;  %v512_v33 = vld [vmem:[%s2420_s28 + $0x14] sm:$0x1] }
  0x18   : > { %v543_v28 = vrot.slane %v541_v22, 4  ;;  %v546_v30 = vrot.slane %v544_v23, 5  ;;  %v513_v36 = vld [vmem:[%s2420_s28 + $0x18] sm:$0xf]  ;;  %v514_v37 = vld [vmem:[%s2420_s28 + $0x1c] sm:$0x1] }
  0x19   : > { %v533_v35 = vor.u32 %v532_v26, %v529_v25  ;;  %v555_v38 = vshrl.u32 %v511_v32, 16  ;;  %v558_v39 = vshll.u32 %v511_v32, 16  ;;  %v564_v42 = vshll.u32 %v512_v33, 16  ;;  %v2318_v57 = vld [vmem:[%s2420_s28 + $0x78] ss:$8 sps:$4 sm:$0xff]  }
  0x1a   : > { %v547_v41 = vor.u32 %v546_v30, %v543_v28  ;;  %v569_v43 = vshrl.u32 %v513_v36, 16  ;;  %v572_v44 = vshll.u32 %v513_v36, 16  ;;  %v578_v48 = vshll.u32 %v514_v37, 16  ;;  %v515_v58 = vld [vmem:[%s2420_s28 + $0x20] sm:$0xf] }
  0x1b   : > { %v534_v45 = vrot.slane %v533_v35, 4  ;;  %v557_v46 = vrot.slane %v555_v38, 4  ;;  %v560_v47 = vrot.slane %v558_v39, 5  ;;  %v566_v55 = vrot.slane %v564_v42, 5  ;;  %v516_v59 = vld [vmem:[%s2420_s28 + $0x24] sm:$0x1] }
  0x1c   : > { %v548_v49 = vrot.slane %v547_v41, 4  ;;  %v571_v50 = vrot.slane %v569_v43, 4  ;;  %v574_v51 = vrot.slane %v572_v44, 5  ;;  %v580_v56 = vrot.slane %v578_v48, 5  ;;  %v517_v62 = vld [vmem:[%s2420_s28 + $0x28] sm:$0xf] }
  0x1d   : > { %2197 = vmatmul.mubr.msk.bf16.vlgmr.msra.gmra.mrb[4].mxu1 %vm279_vm1, %v2316_v17  ;;  %v539_v53 = vsel %vm2457_vm4, %v534_v45, %v538_v27  ;;  %v561_v54 = vor.u32 %v560_v47, %v557_v46  ;;  %v518_v63 = vld [vmem:[%s2420_s28 + $0x2c] sm:$0x1]  ;;  %v583_v0 = vshrl.u32 %v515_v58, 16  ;;  %v586_v1 = vshll.u32 %v515_v58, 16  ;;  %v519_v6 = vld [vmem:[%s2420_s28 + $0x30] sm:$0xf] }
  0x1e   : > { %2215 = vmatpush3.bf16.msra.mxu1 %v802_v7  ;;  %2200 = vmatprep.mubr.msk.bf16.mxu1 %vm279_vm1, %v2317_v29  ;;  %v553_v60 = vsel %vm2457_vm4, %v548_v49, %v552_v31  ;;  %v575_v61 = vor.u32 %v574_v51, %v571_v50  ;;  %v592_v4 = vshll.u32 %v516_v59, 16  ;;  %v597_v5 = vshrl.u32 %v517_v62, 16  ;;  %v520_v11 = vld [vmem:[%s2420_s28 + $0x34] sm:$0x1]  ;;  %v521_v16 = vld [vmem:[%s2420_s28 + $0x38] sm:$0xf] }
  0x1f   : > { %2282 = vmatprep.subr.msk.bf16.mxu1 %vm292_vm0, %v2451_v34  ;;  %v2009_v2 = vcombine.low %v539_v53, %v553_v60  ;;  %v562_v3 = vrot.slane %v561_v54, 4  ;;  %v585_v8 = vrot.slane %v583_v0, 4  ;;  %v588_v9 = vrot.slane %v586_v1, 5  ;;  %v522_v20 = vld [vmem:[%s2420_s28 + $0x3c] sm:$0x1] }
  0x20   : > { %v576_v7 = vrot.slane %v575_v61, 4  ;;  %v600_v10 = vshll.u32 %v517_v62, 16  ;;  %v594_v13 = vrot.slane %v592_v4, 5  ;;  %v599_v14 = vrot.slane %v597_v5, 4  ;;  %v2084_v22 = vld [vmem:[%s2731_s1 + $0xc] sm:$0x3] }
  0x21   : > { %2206 = vmatprep.mubr.msk.bf16.mxu0 %vm279_vm1, %v2009_v2  ;;  %v567_v12 = vsel %vm2457_vm4, %v562_v3, %v566_v55  ;;  %v606_v15 = vshll.u32 %v518_v63, 16  ;;  %v589_v18 = vor.u32 %v588_v9, %v585_v8  ;;  %v611_v21 = vshrl.u32 %v519_v6, 16  ;;  %v2319_v31 = vld [vmem:[%s2420_s28 + $0x90] ss:$8 sps:$4 sm:$0xff]   ;;  %v2320_v41 = vld [vmem:[%s2420_s28 + $0xa0] ss:$8 sps:$4 sm:$0xff]  }
  0x22   : > { %v581_v17 = vsel %vm2457_vm4, %v576_v7, %v580_v56  ;;  %v602_v19 = vrot.slane %v600_v10, 5  ;;  %v614_v25 = vshll.u32 %v519_v6, 16  ;;  %v620_v26 = vshll.u32 %v520_v11, 16  ;;  %v2321_v46 = vld [vmem:[%s2420_s28 + $0xb0] ss:$8 sps:$4 sm:$0xff]  }
  0x23   : > { %v2010_v23 = vcombine.low %v567_v12, %v581_v17  ;;  %v608_v24 = vrot.slane %v606_v15, 5  ;;  %v590_v27 = vrot.slane %v589_v18, 4  ;;  %v613_v29 = vrot.slane %v611_v21, 4  ;;  %v2101_v50 = vld [vmem:[%s2731_s1 + $0xe] sm:$0x3] }
  0x24   : > { %v603_v28 = vor.u32 %v602_v19, %v599_v14  ;;  %v625_v30 = vshrl.u32 %v521_v16, 16  ;;  %v616_v32 = vrot.slane %v614_v25, 5  ;;  %v628_v33 = vshll.u32 %v521_v16, 16  ;;  %v2322_v56 = vld [vmem:[%s2420_s28 + $0xc0] ss:$8 sps:$4 sm:$0xff]  }
  0x25   : > { %2201 = vmatmul.mubr.msk.bf16.gmra.mrb[8].mxu1 %vm279_vm1, %v2318_v57  ;;  %2207 = vmatmul.mubr.msk.bf16.vlgmr.msra.gmra.mrb[4].mxu0 %vm279_vm1, %v2010_v23  ;;  %v634_v35 = vshll.u32 %v522_v20, 16  ;;  %v1185_v36 = vsel %vm292_vm0, %v2451_v34, 0  ;;  %v595_v37 = vsel %vm2457_vm4, %v590_v27, %v594_v13  ;;  %v622_v43 = vrot.slane %v620_v26, 5  ;;  %v2323_v57 = vld [vmem:[%s2420_s28 + $0xd8] ss:$8 sps:$4 sm:$0xff]  }
  0x26   : > { %v604_v38 = vrot.slane %v603_v28, 4  ;;  %2225 = vmatpush3.bf16.msra.mxu0 %v939_v52  ;;  %v627_v39 = vrot.slane %v625_v30, 4  ;;  %2216 = vmatprep.mubr.msk.bf16.mxu1 %vm279_vm1, %v2319_v31  ;;  %v617_v42 = vor.u32 %v616_v32, %v613_v29  ;;  %v630_v44 = vrot.slane %v628_v33, 5  ;;  %v2051_v59 = vld [vmem:[%s2420_s28 + $0x90] sm:$0xf] }
  0x27   : > { %2283 = vmatprep.subr.msk.bf16.mxu0 %vm292_vm0, %v2084_v22  ;;  %v636_v49 = vrot.slane %v634_v35, 5  ;;  %v2509_v53 = vsel %vm292_vm0, %v2084_v22, 0  ;;  %v2512_v54 = vsel %vm292_vm0, %v2101_v50, 0  ;;  %v2052_v60 = vld [vmem:[%s2420_s28 + $0x94] sm:$0x1]  ;;  %v1047_v63 = vshrl.u32 %v2051_v59, 16 }
  0x28   : > { %v609_v45 = vsel %vm2457_vm4, %v604_v38, %v608_v24  ;;  %v618_v47 = vrot.slane %v617_v42, 4  ;;  %v631_v48 = vor.u32 %v630_v44, %v627_v39  ;;  %v2053_v61 = vld [vmem:[%s2420_s28 + $0x98] sm:$0xf]  ;;  %v2054_v62 = vld [vmem:[%s2420_s28 + $0x9c] sm:$0x1]  ;;  %v1050_v0 = vshll.u32 %v2051_v59, 16 }
  0x29   : > { %v2011_v34 = vcombine.low %v595_v37, %v609_v45  ;;  %v1056_v1 = vshll.u32 %v2052_v60, 16  ;;  %v1061_v2 = vshrl.u32 %v2053_v61, 16  ;;  %v1064_v3 = vshll.u32 %v2053_v61, 16  ;;  %v2055_v5 = vld [vmem:[%s2420_s28 + $0xa0] sm:$0xf] }
  0x2a   : > { %v623_v51 = vsel %vm2457_vm4, %v618_v47, %v622_v43  ;;  %v632_v52 = vrot.slane %v631_v48, 4  ;;  %v1070_v4 = vshll.u32 %v2054_v62, 16  ;;  %v2056_v6 = vld [vmem:[%s2420_s28 + $0xa4] sm:$0x1]  ;;  %v1049_v7 = vrot.slane %v1047_v63, 4 }
  0x2b   : > { %2210 = vmatprep.mubr.msk.bf16.mxu0 %vm279_vm1, %v2011_v34  ;;  %v1052_v8 = vrot.slane %v1050_v0, 5  ;;  %v1058_v9 = vrot.slane %v1056_v1, 5  ;;  %v1063_v10 = vrot.slane %v1061_v2, 4  ;;  %v2057_v11 = vld [vmem:[%s2420_s28 + $0xa8] sm:$0xf]  ;;  %v1066_v13 = vrot.slane %v1064_v3, 5 }
  0x2c   : > { %v637_v55 = vsel %vm2457_vm4, %v632_v52, %v636_v49  ;;  %v2324_v12 = vld [vmem:[%s2420_s28 + $0xe8] ss:$8 sps:$4 sm:$0xff]   ;;  %v1072_v14 = vrot.slane %v1070_v4, 5  ;;  %v2058_v15 = vld [vmem:[%s2420_s28 + $0xac] sm:$0x1]  ;;  %v1075_v16 = vshrl.u32 %v2055_v5, 16 }
  0x2d   : > { %2217 = vmatmul.mubr.msk.bf16.vlgmr.msra.gmra.mrb[12].mxu1 %vm279_vm1, %v2320_v41  ;;  %v2012_v58 = vcombine.low %v623_v51, %v637_v55  ;;  %v1078_v17 = vshll.u32 %v2055_v5, 16  ;;  %v2325_v18 = vld [vmem:[%s2420_s28 + $0xf8] ss:$8 sps:$4 sm:$0xff]   ;;  %v1053_v19 = vor.u32 %v1052_v8, %v1049_v7  ;;  %v1084_v20 = vshll.u32 %v2056_v6, 16  ;;  %v2059_v23 = vld [vmem:[%s2420_s28 + $0xb0] sm:$0xf] }
  0x2e   : > { %2220 = vmatprep.mubr.msk.bf16.mxu1 %vm279_vm1, %v2321_v46  ;;  %2235 = vmatpush3.bf16.msra.mxu1 %v1185_v36  ;;  %v1089_v21 = vshrl.u32 %v2057_v11, 16  ;;  %v1092_v22 = vshll.u32 %v2057_v11, 16  ;;  %v1067_v24 = vor.u32 %v1066_v13, %v1063_v10  ;;  %v1077_v25 = vrot.slane %v1075_v16, 4  ;;  %v2060_v28 = vld [vmem:[%s2420_s28 + $0xb4] sm:$0x1] }
  0x2f   : > { %2284 = vmatprep.subr.msk.bf16.mxu1 %vm292_vm0, %v2101_v50  ;;  %2211 = vmatmul.mubr.msk.bf16.gmra.mrb[8].mxu0 %vm279_vm1, %v2012_v58  ;;  %v1080_v26 = vrot.slane %v1078_v17, 5  ;;  %v1098_v27 = vshll.u32 %v2058_v15, 16  ;;  %v1054_v29 = vrot.slane %v1053_v19, 4  ;;  %v1086_v30 = vrot.slane %v1084_v20, 5  ;;  %v2061_v33 = vld [vmem:[%s2420_s28 + $0xb8] sm:$0xf] }
  0x30   : > { %2226 = vmatprep.mubr.msk.bf16.mxu0 %vm279_vm1, %v2323_v57  ;;  %v1091_v31 = vrot.slane %v1089_v21, 4  ;;  %v1094_v32 = vrot.slane %v1092_v22, 5  ;;  %v1068_v35 = vrot.slane %v1067_v24, 4  ;;  %v1103_v38 = vshrl.u32 %v2059_v23, 16  ;;  %v2126_v39 = vld [vmem:[%s2731_s1 + $0x10] sm:$0x3] }
  0x31   : > { %v1081_v36 = vor.u32 %v1080_v26, %v1077_v25  ;;  %v1100_v37 = vrot.slane %v1098_v27, 5  ;;  %v1059_v41 = vsel %vm2457_vm4, %v1054_v29, %v1058_v9  ;;  %v2062_v43 = vld [vmem:[%s2420_s28 + $0xbc] sm:$0x1]  ;;  %v1106_v44 = vshll.u32 %v2059_v23, 16  ;;  %v2063_v46 = vld [vmem:[%s2420_s28 + $0xc0] sm:$0xf] }
  0x32   : > { %v1095_v42 = vor.u32 %v1094_v32, %v1091_v31  ;;  %v1112_v45 = vshll.u32 %v2060_v28, 16  ;;  %v1073_v34 = vsel %vm2457_vm4, %v1068_v35, %v1072_v14  ;;  %v1105_v48 = vrot.slane %v1103_v38, 4  ;;  %v2064_v50 = vld [vmem:[%s2420_s28 + $0xc4] sm:$0x1]  ;;  %v2065_v57 = vld [vmem:[%s2420_s28 + $0xc8] sm:$0xf] }
  0x33   : > { %v1082_v47 = vrot.slane %v1081_v36, 4  ;;  %v1117_v49 = vshrl.u32 %v2061_v33, 16  ;;  %v2068_v51 = vcombine.low %v1059_v41, %v1073_v34  ;;  %v1108_v55 = vrot.slane %v1106_v44, 5  ;;  %v2326_v58 = vld [vmem:[%s2420_s28 + $0x108] ss:$8 sps:$4 sm:$0xff]  }
  0x34   : > { %v1096_v52 = vrot.slane %v1095_v42, 4  ;;  %v1120_v61 = vshll.u32 %v2061_v33, 16  ;;  %v1126_v62 = vshll.u32 %v2062_v43, 16  ;;  %v2066_v0 = vld [vmem:[%s2420_s28 + $0xcc] sm:$0x1]  ;;  %v1131_v1 = vshrl.u32 %v2063_v46, 16 }
  0x35   : > { %2221 = vmatmul.mubr.msk.bf16.gmra.mrb[16].mxu1 %vm279_vm1, %v2322_v56  ;;  %v1114_v56 = vrot.slane %v1112_v45, 5  ;;  %v1087_v59 = vsel %vm2457_vm4, %v1082_v47, %v1086_v30  ;;  %v1119_v60 = vrot.slane %v1117_v49, 4  ;;  %v1109_v63 = vor.u32 %v1108_v55, %v1105_v48  ;;  %v2327_v6 = vld [vmem:[%s2420_s28 + $0x8] ss:$8 sps:$4 sm:$0xff]   ;;  %v2328_v27 = vld [vmem:[%s2420_s28 + $0x18] ss:$8 sps:$4 sm:$0xff]  }
  0x36   : > { %2236 = vmatprep.mubr.msk.bf16.mxu1 %vm279_vm1, %v2068_v51  ;;  %v1134_v2 = vshll.u32 %v2063_v46, 16  ;;  %v1122_v4 = vrot.slane %v1120_v61, 5  ;;  %v1140_v5 = vshll.u32 %v2064_v50, 16  ;;  %v1133_v8 = vrot.slane %v1131_v1, 4  ;;  %v2329_v29 = vld [vmem:[%s2420_s28 + $0x28] ss:$8 sps:$4 sm:$0xff]  }
  0x37   : > { %2227 = vmatmul.mubr.msk.bf16.vlgmr.msra.gmra.mrb[12].mxu0 %vm279_vm1, %v2324_v12  ;;  %v1110_v7 = vrot.slane %v1109_v63, 4  ;;  %v1145_v10 = vshrl.u32 %v2065_v57, 16  ;;  %v1128_v12 = vrot.slane %v1126_v62, 5  ;;  %v1148_v13 = vshll.u32 %v2065_v57, 16  ;;  %v2331_v31 = vld [vmem:[%s2420_s28 + $0x50] ss:$8 sps:$4 sm:$0xff]  }
  0x38   : > { %2230 = vmatprep.mubr.msk.bf16.mxu0 %vm279_vm1, %v2325_v18  ;;  %2245 = vmatpush3.bf16.msra.mxu0 %v2509_v53  ;;  %v1101_v53 = vsel %vm2457_vm4, %v1096_v52, %v1100_v37  ;;  %v1136_v9 = vrot.slane %v1134_v2, 5  ;;  %v1123_v11 = vor.u32 %v1122_v4, %v1119_v60  ;;  %v1154_v14 = vshll.u32 %v2066_v0, 16  ;;  %v2110_v32 = vld [vmem:[%s2420_s28 + $0x8] sm:$0xf]  ;;  %v2111_v35 = vld [vmem:[%s2420_s28 + $0xc] sm:$0x1] }
  0x39   : > { %2285 = vmatprep.subr.msk.bf16.mxu0 %vm292_vm0, %v2126_v39  ;;  %v2069_v3 = vcombine.low %v1087_v59, %v1101_v53  ;;  %v1147_v16 = vrot.slane %v1145_v10, 4  ;;  %v1115_v17 = vsel %vm2457_vm4, %v1110_v7, %v1114_v56  ;;  %v1142_v19 = vrot.slane %v1140_v5, 5  ;;  %v2112_v36 = vld [vmem:[%s2420_s28 + $0x10] sm:$0xf]  ;;  %v2113_v37 = vld [vmem:[%s2420_s28 + $0x14] sm:$0x1] }
  0x3a   : > { %v1137_v15 = vor.u32 %v1136_v9, %v1133_v8  ;;  %v1124_v18 = vrot.slane %v1123_v11, 4  ;;  %v1150_v20 = vrot.slane %v1148_v13, 5  ;;  %v1156_v23 = vrot.slane %v1154_v14, 5  ;;  %v2114_v43 = vld [vmem:[%s2420_s28 + $0x18] sm:$0xf] }
  0x3b   : > { %v1706_v28 = vsel %vm292_vm0, %v2126_v39, 0  ;;  %v1568_v38 = vshrl.u32 %v2110_v32, 16  ;;  %v1571_v41 = vshll.u32 %v2110_v32, 16  ;;  %v1577_v39 = vshll.u32 %v2111_v35, 16  ;;  %v2115_v46 = vld [vmem:[%s2420_s28 + $0x1c] sm:$0x1] }
  0x3c   : > { %v1138_v21 = vrot.slane %v1137_v15, 4  ;;  %v1151_v22 = vor.u32 %v1150_v20, %v1147_v16  ;;  %v1582_v42 = vshrl.u32 %v2112_v36, 16  ;;  %v1585_v44 = vshll.u32 %v2112_v36, 16  ;;  %v2116_v34 = vld [vmem:[%s2420_s28 + $0x20] sm:$0xf] }
  0x3d   : > { %2237 = vmatmul.mubr.msk.bf16.vlgmr.msra.gmra.mrb[20].mxu1 %vm279_vm1, %v2069_v3  ;;  %v1591_v45 = vshll.u32 %v2113_v37, 16  ;;  %v2330_v47 = vld [vmem:[%s2420_s28 + $0x38] ss:$8 sps:$4 sm:$0xff]   ;;  %v1570_v48 = vrot.slane %v1568_v38, 4  ;;  %v1573_v49 = vrot.slane %v1571_v41, 5  ;;  %v1579_v50 = vrot.slane %v1577_v39, 5 }
  0x3e   : > { %2255 = vmatpush3.bf16.msra.mxu1 %v2512_v54  ;;  %v1129_v54 = vsel %vm2457_vm4, %v1124_v18, %v1128_v12  ;;  %v1143_v25 = vsel %vm2457_vm4, %v1138_v21, %v1142_v19  ;;  %v1152_v26 = vrot.slane %v1151_v22, 4  ;;  %v1584_v51 = vrot.slane %v1582_v42, 4  ;;  %v2117_v52 = vld [vmem:[%s2420_s28 + $0x24] sm:$0x1]  ;;  %v2332_v55 = vld [vmem:[%s2420_s28 + $0x60] ss:$8 sps:$4 sm:$0xff]  }
  0x3f   : > { %2231 = vmatmul.mubr.msk.bf16.gmra.mrb[16].mxu0 %vm279_vm1, %v2326_v58  ;;  %v2070_v24 = vcombine.low %v1115_v17, %v1129_v54  ;;  %v1587_v56 = vrot.slane %v1585_v44, 5  ;;  %v1593_v57 = vrot.slane %v1591_v45, 5  ;;  %v1596_v58 = vshrl.u32 %v2114_v43, 16  ;;  %v2333_v60 = vld [vmem:[%s2420_s28 + $0x70] ss:$8 sps:$4 sm:$0xff]  }
  0x40   : > { %2246 = vmatprep.mubr.msk.bf16.mxu0 %vm279_vm1, %v2327_v6  ;;  %v1157_v30 = vsel %vm2457_vm4, %v1152_v26, %v1156_v23  ;;  %v1599_v59 = vshll.u32 %v2114_v43, 16  ;;  %v1574_v61 = vor.u32 %v1573_v49, %v1570_v48  ;;  %v1605_v62 = vshll.u32 %v2115_v46, 16  ;;  %v2118_v0 = vld [vmem:[%s2420_s28 + $0x28] sm:$0xf]  ;;  %v2119_v5 = vld [vmem:[%s2420_s28 + $0x2c] sm:$0x1] }
  0x41   : > { %2240 = vmatprep.mubr.msk.bf16.mxu1 %vm279_vm1, %v2070_v24  ;;  %v2071_v33 = vcombine.low %v1143_v25, %v1157_v30  ;;  %v1610_v53 = vshrl.u32 %v2116_v34, 16  ;;  %v1613_v63 = vshll.u32 %v2116_v34, 16  ;;  %v1588_v1 = vor.u32 %v1587_v56, %v1584_v51  ;;  %v2120_v10 = vld [vmem:[%s2420_s28 + $0x30] sm:$0xf]  ;;  %v2121_v17 = vld [vmem:[%s2420_s28 + $0x34] sm:$0x1] }
  0x42   : > { %v1598_v2 = vrot.slane %v1596_v58, 4  ;;  %v1601_v3 = vrot.slane %v1599_v59, 5  ;;  %v1619_v4 = vshll.u32 %v2117_v52, 16  ;;  %v1575_v6 = vrot.slane %v1574_v61, 4  ;;  %v2122_v23 = vld [vmem:[%s2420_s28 + $0x38] sm:$0xf] }
  0x43   : > { %v1607_v7 = vrot.slane %v1605_v62, 5  ;;  %v1612_v8 = vrot.slane %v1610_v53, 4  ;;  %v1615_v9 = vrot.slane %v1613_v63, 5  ;;  %v1589_v11 = vrot.slane %v1588_v1, 4  ;;  %v2124_v32 = vld [vmem:[%s2420_s28 + $0x40] sm:$0xf] }
  0x44   : > { %v1602_v12 = vor.u32 %v1601_v3, %v1598_v2  ;;  %v1621_v13 = vrot.slane %v1619_v4, 5  ;;  %v1624_v14 = vshrl.u32 %v2118_v0, 16  ;;  %v1580_v15 = vsel %vm2457_vm4, %v1575_v6, %v1579_v50  ;;  %v2125_v36 = vld [vmem:[%s2420_s28 + $0x44] sm:$0x1]  ;;  %v2334_v41 = vld [vmem:[%s2420_s28 + $0x80] ss:$8 sps:$4 sm:$0xff]  }
  0x45   : > { %2241 = vmatmul.mubr.msk.bf16.gmra.mrb[24].mxu1 %vm279_vm1, %v2071_v33  ;;  %v1616_v16 = vor.u32 %v1615_v9, %v1612_v8  ;;  %v1627_v18 = vshll.u32 %v2118_v0, 16  ;;  %v1633_v19 = vshll.u32 %v2119_v5, 16  ;;  %v1594_v20 = vsel %vm2457_vm4, %v1589_v11, %v1593_v57 }
  0x46   : > { %2256 = vmatprep.mubr.msk.bf16.mxu1 %vm279_vm1, %v2331_v31  ;;  %v1603_v21 = vrot.slane %v1602_v12, 4  ;;  %v1626_v54 = vrot.slane %v1624_v14, 4  ;;  %v1638_v22 = vshrl.u32 %v2120_v10, 16  ;;  %v2127_v24 = vcombine.low %v1580_v15, %v1594_v20 }
  0x47   : > { %2247 = vmatmul.mubr.msk.bf16.vlgmr.msra.gmra.mrb[20].mxu0 %vm279_vm1, %v2328_v27  ;;  %v1617_v25 = vrot.slane %v1616_v16, 4  ;;  %v1629_v26 = vrot.slane %v1627_v18, 5  ;;  %v2123_v27 = vld [vmem:[%s2420_s28 + $0x3c] sm:$0x1]  ;;  %v1641_v30 = vshll.u32 %v2120_v10, 16  ;;  %v1647_v31 = vshll.u32 %v2121_v17, 16 }
  0x48   : > { %2250 = vmatprep.mubr.msk.bf16.mxu0 %vm279_vm1, %v2329_v29  ;;  %2265 = vmatpush3.bf16.msra.mxu0 %v1706_v28  ;;  %v1608_v28 = vsel %vm2457_vm4, %v1603_v21, %v1607_v7  ;;  %v1640_v29 = vrot.slane %v1638_v22, 4  ;;  %v1652_v37 = vshrl.u32 %v2122_v23, 16  ;;  %v1655_v38 = vshll.u32 %v2122_v23, 16 }
  0x49   : > { %v1622_v33 = vsel %vm2457_vm4, %v1617_v25, %v1621_v13  ;;  %v1630_v35 = vor.u32 %v1629_v26, %v1626_v54  ;;  %v1635_v42 = vrot.slane %v1633_v19, 5  ;;  %v1643_v43 = vrot.slane %v1641_v30, 5 }
  0x4a   : > { %v2128_v39 = vcombine.low %v1608_v28, %v1622_v33  ;;  %v1661_v44 = vshll.u32 %v2123_v27, 16  ;;  %v1654_v46 = vrot.slane %v1652_v37, 4  ;;  %v1657_v34 = vrot.slane %v1655_v38, 5 }
  0x4b   : > { %v1631_v45 = vrot.slane %v1630_v35, 4  ;;  %v1644_v48 = vor.u32 %v1643_v43, %v1640_v29  ;;  %v1649_v49 = vrot.slane %v1647_v31, 5  ;;  %v1669_v50 = vshll.u32 %v2124_v32, 16 }
  0x4c   : > { %v1675_v51 = vshll.u32 %v2125_v36, 16  ;;  %v1658_v52 = vor.u32 %v1657_v34, %v1654_v46  ;;  %v1663_v58 = vrot.slane %v1661_v44, 5 }
  0x4d   : > { %2257 = vmatmul.mubr.msk.bf16.vlgmr.msra.gmra.mrb[28].mxu1 %vm279_vm1, %v2332_v55  ;;  %v1636_v56 = vsel %vm2457_vm4, %v1631_v45, %v1635_v42  ;;  %v1645_v57 = vrot.slane %v1644_v48, 4  ;;  %v1671_v59 = vrot.slane %v1669_v50, 5 }
  0x4e   : > { %2260 = vmatprep.mubr.msk.bf16.mxu1 %vm279_vm1, %v2333_v60  ;;  %v1659_v60 = vrot.slane %v1658_v52, 4  ;;  %v1677_v53 = vrot.slane %v1675_v51, 5 }
  0x4f   : > { %2251 = vmatmul.mubr.msk.bf16.gmra.mrb[24].mxu0 %vm279_vm1, %v2330_v47  ;;  %v1666_v47 = vshrl.u32 %v2124_v32, 16  ;;  %v1650_v61 = vsel %vm2457_vm4, %v1645_v57, %v1649_v49 }
  0x50   : > { %2266 = vmatprep.mubr.msk.bf16.mxu0 %vm279_vm1, %v2127_v24  ;;  %v2129_v63 = vcombine.low %v1636_v56, %v1650_v61  ;;  %v1664_v0 = vsel %vm2457_vm4, %v1659_v60, %v1663_v58 }
  0x51   : > { %v1668_v55 = vrot.slane %v1666_v47, 4 }
  0x53   : > { %v1672_v62 = vor.u32 %v1671_v59, %v1668_v55 }
  0x55   : > { %2261 = vmatmul.mubr.msk.bf16.gmra.mrb[32].mxu1 %vm279_vm1, %v2334_v41  ;;  %v1673_v1 = vrot.slane %v1672_v62, 4 }
  0x57   : > { %2267 = vmatmul.mubr.msk.bf16.vlgmr.msra.gmra.mrb[28].mxu0 %vm279_vm1, %v2128_v39  ;;  %v1678_v2 = vsel %vm2457_vm4, %v1673_v1, %v1677_v53 }
  0x58   : > { %2270 = vmatprep.mubr.msk.bf16.mxu0 %vm279_vm1, %v2129_v63  ;;  %v2130_v3 = vcombine.low %v1664_v0, %v1678_v2 }
  0x5f   : > { %2271 = vmatmul.mubr.msk.bf16.gmra.mrb[32].mxu0 %vm279_vm1, %v2130_v3 }
  0xe7   : > { %v2188_v4 = vpop.f32.mrb[0].mxu0 }
  0xe8   : > { %364 = vst.msk [vmem:[#allocation2 + $0x10] sm:$0xff] %vm361_vm5, %v2188_v4  ;;  %v2192_v5 = vpop.f32.mrb[0].mxu1  ;;  %v330_v6 = vpop.f32.mrb[1].mxu0 }
  0xe9   : > { %368 = vst.msk [vmem:[#allocation2 + $0x30] sm:$0xff] %vm361_vm5, %v2192_v5  ;;  %362 = vst.msk [vmem:[#allocation2] sm:$0xff] %vm361_vm5, %v330_v6  ;;  %v346_v7 = vpop.f32.mrb[1].mxu1  ;;  %v2189_v8 = vpop.f32.mrb[2].mxu0 }
  0xea   : > { %366 = vst.msk [vmem:[#allocation2 + $0x20] sm:$0xff] %vm361_vm5, %v346_v7  ;;  %365 = vst.msk [vmem:[#allocation2 + $0x18] sm:$0xff] %vm361_vm5, %v2189_v8  ;;  %v2193_v40 = vpop.f32.mrb[2].mxu1  ;;  %v333_v9 = vpop.f32.mrb[3].mxu0 }
  0xeb   : > { %369 = vst.msk [vmem:[#allocation2 + $0x38] sm:$0xff] %vm361_vm5, %v2193_v40  ;;  %363 = vst.msk [vmem:[#allocation2 + $0x8] sm:$0xff] %vm361_vm5, %v333_v9  ;;  %v349_v10 = vpop.f32.mrb[3].mxu1 }
  0xec   : > { %367 = vst.msk [vmem:[#allocation2 + $0x28] sm:$0xff] %vm361_vm5, %v349_v10 }
  0xef   : > { %v485_v11 = vld [vmem:[#allocation2 + $0x10] sm:$0xff] }
  0xf0   : > { %v2198_v12 = vpop.f32.mrb[4].mxu1  ;;  %v483_v13 = vld [vmem:[#allocation2] sm:$0xff]  ;;  %v489_v23 = vld [vmem:[#allocation2 + $0x30] sm:$0xff] }
  0xf1   : > { %v493_v14 = vadd.f32 %v2198_v12, %v485_v11  ;;  %v452_v15 = vpop.f32.mrb[5].mxu1  ;;  %v486_v16 = vld [vmem:[#allocation2 + $0x18] sm:$0xff]  ;;  %v487_v26 = vld [vmem:[#allocation2 + $0x20] sm:$0xff] }
  0xf2   : > { %v491_v17 = vadd.f32 %v483_v13, %v452_v15  ;;  %v2199_v18 = vpop.f32.mrb[6].mxu1  ;;  %v484_v19 = vld [vmem:[#allocation2 + $0x8] sm:$0xff]  ;;  %v490_v31 = vld [vmem:[#allocation2 + $0x38] sm:$0xff] }
  0xf3   : > { %501 = vst.msk [vmem:[#allocation2 + $0x10] sm:$0xff] %vm361_vm5, %v493_v14  ;;  %v494_v20 = vadd.f32 %v2199_v18, %v486_v16  ;;  %v455_v21 = vpop.f32.mrb[7].mxu1  ;;  %v488_v38 = vld [vmem:[#allocation2 + $0x28] sm:$0xff] }
  0xf4   : > { %499 = vst.msk [vmem:[#allocation2] sm:$0xff] %vm361_vm5, %v491_v17  ;;  %v492_v54 = vadd.f32 %v484_v19, %v455_v21 }
  0xf5   : > { %502 = vst.msk [vmem:[#allocation2 + $0x18] sm:$0xff] %vm361_vm5, %v494_v20 }
  0xf6   : > { %500 = vst.msk [vmem:[#allocation2 + $0x8] sm:$0xff] %vm361_vm5, %v492_v54 }
  0xf8   : > { %v2202_v22 = vpop.f32.mrb[8].mxu1  ;;  %v2208_v27 = vpop.f32.mrb[4].mxu0 }
  0xf9   : > { %v497_v24 = vadd.f32 %v2202_v22, %v489_v23  ;;  %v468_v25 = vpop.f32.mrb[9].mxu1  ;;  %v701_v33 = vpop.f32.mrb[5].mxu0 }
  0xfa   : > { %v734_v28 = vld [vmem:[#allocation2 + $0x10] sm:$0xff]  ;;  %v495_v29 = vadd.f32 %v487_v26, %v468_v25  ;;  %v2203_v30 = vpop.f32.mrb[10].mxu1  ;;  %v2209_v39 = vpop.f32.mrb[6].mxu0 }
  0xfb   : > { %v742_v32 = vadd.f32 %v2208_v27, %v734_v28  ;;  %505 = vst.msk [vmem:[#allocation2 + $0x30] sm:$0xff] %vm361_vm5, %v497_v24  ;;  %v732_v35 = vld [vmem:[#allocation2] sm:$0xff]  ;;  %v498_v36 = vadd.f32 %v2203_v30, %v490_v31  ;;  %v471_v37 = vpop.f32.mrb[11].mxu1  ;;  %v704_v45 = vpop.f32.mrb[7].mxu0 }
  0xfc   : > { %v740_v41 = vadd.f32 %v732_v35, %v701_v33  ;;  %503 = vst.msk [vmem:[#allocation2 + $0x20] sm:$0xff] %vm361_vm5, %v495_v29  ;;  %v735_v42 = vld [vmem:[#allocation2 + $0x18] sm:$0xff]  ;;  %v496_v43 = vadd.f32 %v488_v38, %v471_v37 }
  0xfd   : > { %750 = vst.msk [vmem:[#allocation2 + $0x10] sm:$0xff] %vm361_vm5, %v742_v32  ;;  %v743_v44 = vadd.f32 %v2209_v39, %v735_v42  ;;  %506 = vst.msk [vmem:[#allocation2 + $0x38] sm:$0xff] %vm361_vm5, %v498_v36  ;;  %v733_v46 = vld [vmem:[#allocation2 + $0x8] sm:$0xff] }
  0xfe   : > { %748 = vst.msk [vmem:[#allocation2] sm:$0xff] %vm361_vm5, %v740_v41  ;;  %v741_v34 = vadd.f32 %v733_v46, %v704_v45  ;;  %504 = vst.msk [vmem:[#allocation2 + $0x28] sm:$0xff] %vm361_vm5, %v496_v43 }
  0xff   : > { %751 = vst.msk [vmem:[#allocation2 + $0x18] sm:$0xff] %vm361_vm5, %v743_v44 }
 0x100   : > { %749 = vst.msk [vmem:[#allocation2 + $0x8] sm:$0xff] %vm361_vm5, %v741_v34  ;;  %v2218_v47 = vpop.f32.mrb[12].mxu1 }
 0x101   : > { %v838_v48 = vpop.f32.mrb[13].mxu1 }
 0x102   : > { %v2219_v49 = vpop.f32.mrb[14].mxu1  ;;  %v738_v50 = vld [vmem:[#allocation2 + $0x30] sm:$0xff]  ;;  %v2212_v56 = vpop.f32.mrb[8].mxu0 }
 0x103   : > { %v841_v51 = vpop.f32.mrb[15].mxu1  ;;  %v736_v52 = vld [vmem:[#allocation2 + $0x20] sm:$0xff]  ;;  %v746_v60 = vadd.f32 %v2212_v56, %v738_v50  ;;  %v717_v61 = vpop.f32.mrb[9].mxu0 }
 0x104   : > { %v871_v55 = vld [vmem:[#allocation2 + $0x10] sm:$0xff]  ;;  %v739_v57 = vld [vmem:[#allocation2 + $0x38] sm:$0xff]  ;;  %v744_v0 = vadd.f32 %v736_v52, %v717_v61  ;;  %v2213_v1 = vpop.f32.mrb[10].mxu0 }
 0x105   : > { %v879_v58 = vadd.f32 %v2218_v47, %v871_v55  ;;  %v869_v59 = vld [vmem:[#allocation2] sm:$0xff]  ;;  %v737_v62 = vld [vmem:[#allocation2 + $0x28] sm:$0xff]  ;;  %754 = vst.msk [vmem:[#allocation2 + $0x30] sm:$0xff] %vm361_vm5, %v746_v60  ;;  %v747_v4 = vadd.f32 %v2213_v1, %v739_v57  ;;  %v720_v5 = vpop.f32.mrb[11].mxu0 }
 0x106   : > { %v877_v53 = vadd.f32 %v869_v59, %v838_v48  ;;  %v872_v63 = vld [vmem:[#allocation2 + $0x18] sm:$0xff]  ;;  %752 = vst.msk [vmem:[#allocation2 + $0x20] sm:$0xff] %vm361_vm5, %v744_v0  ;;  %v745_v8 = vadd.f32 %v737_v62, %v720_v5 }
 0x107   : > { %887 = vst.msk [vmem:[#allocation2 + $0x10] sm:$0xff] %vm361_vm5, %v879_v58  ;;  %v880_v2 = vadd.f32 %v2219_v49, %v872_v63  ;;  %v870_v3 = vld [vmem:[#allocation2 + $0x8] sm:$0xff]  ;;  %755 = vst.msk [vmem:[#allocation2 + $0x38] sm:$0xff] %vm361_vm5, %v747_v4 }
 0x108   : > { %885 = vst.msk [vmem:[#allocation2] sm:$0xff] %vm361_vm5, %v877_v53  ;;  %v878_v6 = vadd.f32 %v870_v3, %v841_v51  ;;  %v2222_v7 = vpop.f32.mrb[16].mxu1  ;;  %753 = vst.msk [vmem:[#allocation2 + $0x28] sm:$0xff] %vm361_vm5, %v745_v8 }
 0x109   : > { %888 = vst.msk [vmem:[#allocation2 + $0x18] sm:$0xff] %vm361_vm5, %v880_v2  ;;  %v854_v40 = vpop.f32.mrb[17].mxu1 }
 0x10a   : > { %886 = vst.msk [vmem:[#allocation2 + $0x8] sm:$0xff] %vm361_vm5, %v878_v6  ;;  %v2223_v9 = vpop.f32.mrb[18].mxu1  ;;  %v2228_v11 = vpop.f32.mrb[12].mxu0 }
 0x10b   : > { %v857_v10 = vpop.f32.mrb[19].mxu1  ;;  %v975_v13 = vpop.f32.mrb[13].mxu0 }
 0x10c   : > { %v875_v14 = vld [vmem:[#allocation2 + $0x30] sm:$0xff]  ;;  %v2229_v17 = vpop.f32.mrb[14].mxu0 }
 0x10d   : > { %v883_v18 = vadd.f32 %v2222_v7, %v875_v14  ;;  %v873_v19 = vld [vmem:[#allocation2 + $0x20] sm:$0xff]  ;;  %v978_v54 = vpop.f32.mrb[15].mxu0 }
 0x10e   : > { %v1008_v12 = vld [vmem:[#allocation2 + $0x10] sm:$0xff]  ;;  %v881_v22 = vadd.f32 %v873_v19, %v854_v40  ;;  %v876_v23 = vld [vmem:[#allocation2 + $0x38] sm:$0xff] }
 0x10f   : > { %v1016_v15 = vadd.f32 %v2228_v11, %v1008_v12  ;;  %v1006_v16 = vld [vmem:[#allocation2] sm:$0xff]  ;;  %891 = vst.msk [vmem:[#allocation2 + $0x30] sm:$0xff] %vm361_vm5, %v883_v18  ;;  %v884_v26 = vadd.f32 %v2223_v9, %v876_v23  ;;  %v874_v27 = vld [vmem:[#allocation2 + $0x28] sm:$0xff] }
 0x110   : > { %v1014_v20 = vadd.f32 %v1006_v16, %v975_v13  ;;  %v1009_v21 = vld [vmem:[#allocation2 + $0x18] sm:$0xff]  ;;  %889 = vst.msk [vmem:[#allocation2 + $0x20] sm:$0xff] %vm361_vm5, %v881_v22  ;;  %v882_v29 = vadd.f32 %v874_v27, %v857_v10  ;;  %v2238_v30 = vpop.f32.mrb[20].mxu1 }
 0x111   : > { %1024 = vst.msk [vmem:[#allocation2 + $0x10] sm:$0xff] %vm361_vm5, %v1016_v15  ;;  %v1017_v24 = vadd.f32 %v2229_v17, %v1009_v21  ;;  %v1007_v25 = vld [vmem:[#allocation2 + $0x8] sm:$0xff]  ;;  %892 = vst.msk [vmem:[#allocation2 + $0x38] sm:$0xff] %vm361_vm5, %v884_v26  ;;  %v1221_v31 = vpop.f32.mrb[21].mxu1 }
 0x112   : > { %1022 = vst.msk [vmem:[#allocation2] sm:$0xff] %vm361_vm5, %v1014_v20  ;;  %v1015_v28 = vadd.f32 %v1007_v25, %v978_v54  ;;  %890 = vst.msk [vmem:[#allocation2 + $0x28] sm:$0xff] %vm361_vm5, %v882_v29  ;;  %v2232_v32 = vpop.f32.mrb[16].mxu0  ;;  %v2239_v33 = vpop.f32.mrb[22].mxu1 }
 0x113   : > { %1025 = vst.msk [vmem:[#allocation2 + $0x18] sm:$0xff] %vm361_vm5, %v1017_v24  ;;  %v991_v35 = vpop.f32.mrb[17].mxu0  ;;  %v1224_v36 = vpop.f32.mrb[23].mxu1 }
 0x114   : > { %1023 = vst.msk [vmem:[#allocation2 + $0x8] sm:$0xff] %vm361_vm5, %v1015_v28  ;;  %v2233_v37 = vpop.f32.mrb[18].mxu0 }
 0x115   : > { %v994_v41 = vpop.f32.mrb[19].mxu0 }
 0x116   : > { %v1012_v39 = vld [vmem:[#allocation2 + $0x30] sm:$0xff] }
 0x117   : > { %v1020_v44 = vadd.f32 %v2232_v32, %v1012_v39  ;;  %v1010_v45 = vld [vmem:[#allocation2 + $0x20] sm:$0xff] }
 0x118   : > { %v1254_v38 = vld [vmem:[#allocation2 + $0x10] sm:$0xff]  ;;  %v1018_v47 = vadd.f32 %v1010_v45, %v991_v35  ;;  %v1013_v48 = vld [vmem:[#allocation2 + $0x38] sm:$0xff]  ;;  %v2242_v58 = vpop.f32.mrb[24].mxu1 }
 0x119   : > { %v1262_v42 = vadd.f32 %v2238_v30, %v1254_v38  ;;  %v1252_v43 = vld [vmem:[#allocation2] sm:$0xff]  ;;  %1028 = vst.msk [vmem:[#allocation2 + $0x30] sm:$0xff] %vm361_vm5, %v1020_v44  ;;  %v1021_v51 = vadd.f32 %v2233_v37, %v1013_v48  ;;  %v1011_v52 = vld [vmem:[#allocation2 + $0x28] sm:$0xff]  ;;  %v1237_v60 = vpop.f32.mrb[25].mxu1 }
 0x11a   : > { %v1260_v46 = vadd.f32 %v1252_v43, %v1221_v31  ;;  %v1255_v34 = vld [vmem:[#allocation2 + $0x18] sm:$0xff]  ;;  %1026 = vst.msk [vmem:[#allocation2 + $0x20] sm:$0xff] %vm361_vm5, %v1018_v47  ;;  %v1019_v56 = vadd.f32 %v1011_v52, %v994_v41  ;;  %v2248_v57 = vpop.f32.mrb[20].mxu0  ;;  %v2243_v62 = vpop.f32.mrb[26].mxu1 }
 0x11b   : > { %1270 = vst.msk [vmem:[#allocation2 + $0x10] sm:$0xff] %vm361_vm5, %v1262_v42  ;;  %v1263_v49 = vadd.f32 %v2239_v33, %v1255_v34  ;;  %v1253_v50 = vld [vmem:[#allocation2 + $0x8] sm:$0xff]  ;;  %1029 = vst.msk [vmem:[#allocation2 + $0x38] sm:$0xff] %vm361_vm5, %v1021_v51  ;;  %v1359_v59 = vpop.f32.mrb[21].mxu0  ;;  %v1240_v63 = vpop.f32.mrb[27].mxu1 }
 0x11c   : > { %1268 = vst.msk [vmem:[#allocation2] sm:$0xff] %vm361_vm5, %v1260_v46  ;;  %v1261_v55 = vadd.f32 %v1253_v50, %v1224_v36  ;;  %1027 = vst.msk [vmem:[#allocation2 + $0x28] sm:$0xff] %vm361_vm5, %v1019_v56  ;;  %v2249_v61 = vpop.f32.mrb[22].mxu0 }
 0x11d   : > { %1271 = vst.msk [vmem:[#allocation2 + $0x18] sm:$0xff] %vm361_vm5, %v1263_v49  ;;  %v1362_v53 = vpop.f32.mrb[23].mxu0 }
 0x11e   : > { %1269 = vst.msk [vmem:[#allocation2 + $0x8] sm:$0xff] %vm361_vm5, %v1261_v55 }
 0x120   : > { %v1258_v1 = vld [vmem:[#allocation2 + $0x30] sm:$0xff]  ;;  %v2258_v16 = vpop.f32.mrb[28].mxu1 }
 0x121   : > { %v1266_v4 = vadd.f32 %v2242_v58, %v1258_v1  ;;  %v1256_v5 = vld [vmem:[#allocation2 + $0x20] sm:$0xff]  ;;  %v1496_v19 = vpop.f32.mrb[29].mxu1 }
 0x122   : > { %v1392_v0 = vld [vmem:[#allocation2 + $0x10] sm:$0xff]  ;;  %v1264_v8 = vadd.f32 %v1256_v5, %v1237_v60  ;;  %v1259_v40 = vld [vmem:[#allocation2 + $0x38] sm:$0xff]  ;;  %v2252_v11 = vpop.f32.mrb[24].mxu0  ;;  %v2259_v21 = vpop.f32.mrb[30].mxu1 }
 0x123   : > { %v1400_v2 = vadd.f32 %v2248_v57, %v1392_v0  ;;  %v1390_v3 = vld [vmem:[#allocation2] sm:$0xff]  ;;  %1274 = vst.msk [vmem:[#allocation2 + $0x30] sm:$0xff] %vm361_vm5, %v1266_v4  ;;  %v1267_v12 = vadd.f32 %v2243_v62, %v1259_v40  ;;  %v1257_v13 = vld [vmem:[#allocation2 + $0x28] sm:$0xff]  ;;  %v1375_v15 = vpop.f32.mrb[25].mxu0  ;;  %v1499_v54 = vpop.f32.mrb[31].mxu1 }
 0x124   : > { %v1398_v6 = vadd.f32 %v1390_v3, %v1359_v59  ;;  %v1393_v7 = vld [vmem:[#allocation2 + $0x18] sm:$0xff]  ;;  %1272 = vst.msk [vmem:[#allocation2 + $0x20] sm:$0xff] %vm361_vm5, %v1264_v8  ;;  %v1265_v17 = vadd.f32 %v1257_v13, %v1240_v63  ;;  %v2253_v18 = vpop.f32.mrb[26].mxu0  ;;  %v2135_v4 = vld [vmem:[%s2732_s2] ss:$0 sm:$0xff] }
 0x125   : > { %1408 = vst.msk [vmem:[#allocation2 + $0x10] sm:$0xff] %vm361_vm5, %v1400_v2  ;;  %v1401_v9 = vadd.f32 %v2249_v61, %v1393_v7  ;;  %v1391_v10 = vld [vmem:[#allocation2 + $0x8] sm:$0xff]  ;;  %1275 = vst.msk [vmem:[#allocation2 + $0x38] sm:$0xff] %vm361_vm5, %v1267_v12  ;;  %v1378_v20 = vpop.f32.mrb[27].mxu0 }
 0x126   : > { %1406 = vst.msk [vmem:[#allocation2] sm:$0xff] %vm361_vm5, %v1398_v6  ;;  %v1399_v14 = vadd.f32 %v1391_v10, %v1362_v53  ;;  %1273 = vst.msk [vmem:[#allocation2 + $0x28] sm:$0xff] %vm361_vm5, %v1265_v17 }
 0x127   : > { %1409 = vst.msk [vmem:[#allocation2 + $0x18] sm:$0xff] %vm361_vm5, %v1401_v9 }
 0x128   : > { %1407 = vst.msk [vmem:[#allocation2 + $0x8] sm:$0xff] %vm361_vm5, %v1399_v14  ;;  %v2262_v31 = vpop.f32.mrb[32].mxu1 }
 0x129   : > { %v1512_v38 = vpop.f32.mrb[33].mxu1 }
 0x12a   : > { %v1396_v23 = vld [vmem:[#allocation2 + $0x30] sm:$0xff]  ;;  %v2268_v26 = vpop.f32.mrb[28].mxu0  ;;  %v2263_v44 = vpop.f32.mrb[34].mxu1 }
 0x12b   : > { %v1404_v27 = vadd.f32 %v2252_v11, %v1396_v23  ;;  %v1394_v28 = vld [vmem:[#allocation2 + $0x20] sm:$0xff]  ;;  %v1742_v32 = vpop.f32.mrb[29].mxu0  ;;  %v1515_v34 = vpop.f32.mrb[35].mxu1 }
 0x12c   : > { %v1529_v22 = vld [vmem:[#allocation2 + $0x10] sm:$0xff]  ;;  %v1402_v33 = vadd.f32 %v1394_v28, %v1375_v15  ;;  %v1397_v35 = vld [vmem:[#allocation2 + $0x38] sm:$0xff]  ;;  %v2269_v41 = vpop.f32.mrb[30].mxu0 }
 0x12d   : > { %v1537_v24 = vadd.f32 %v2258_v16, %v1529_v22  ;;  %v1527_v25 = vld [vmem:[#allocation2] sm:$0xff]  ;;  %1412 = vst.msk [vmem:[#allocation2 + $0x30] sm:$0xff] %vm361_vm5, %v1404_v27  ;;  %v1405_v39 = vadd.f32 %v2253_v18, %v1397_v35  ;;  %v1395_v42 = vld [vmem:[#allocation2 + $0x28] sm:$0xff]  ;;  %v1745_v45 = vpop.f32.mrb[31].mxu0 }
 0x12e   : > { %v1535_v29 = vadd.f32 %v1527_v25, %v1496_v19  ;;  %v1530_v30 = vld [vmem:[#allocation2 + $0x18] sm:$0xff]  ;;  %1410 = vst.msk [vmem:[#allocation2 + $0x20] sm:$0xff] %vm361_vm5, %v1402_v33  ;;  %v1403_v46 = vadd.f32 %v1395_v42, %v1378_v20 }
 0x12f   : > { %1545 = vst.msk [vmem:[#allocation2 + $0x10] sm:$0xff] %vm361_vm5, %v1537_v24  ;;  %v1538_v36 = vadd.f32 %v2259_v21, %v1530_v30  ;;  %v1528_v37 = vld [vmem:[#allocation2 + $0x8] sm:$0xff]  ;;  %1413 = vst.msk [vmem:[#allocation2 + $0x38] sm:$0xff] %vm361_vm5, %v1405_v39 }
 0x130   : > { %1543 = vst.msk [vmem:[#allocation2] sm:$0xff] %vm361_vm5, %v1535_v29  ;;  %v1536_v43 = vadd.f32 %v1528_v37, %v1499_v54  ;;  %1411 = vst.msk [vmem:[#allocation2 + $0x28] sm:$0xff] %vm361_vm5, %v1403_v46 }
 0x131   : > { %1546 = vst.msk [vmem:[#allocation2 + $0x18] sm:$0xff] %vm361_vm5, %v1538_v36 }
 0x132   : > { %1544 = vst.msk [vmem:[#allocation2 + $0x8] sm:$0xff] %vm361_vm5, %v1536_v43  ;;  %v2272_v51 = vpop.f32.mrb[32].mxu0 }
 0x133   : > { %v1758_v58 = vpop.f32.mrb[33].mxu0 }
 0x134   : > { %v1533_v48 = vld [vmem:[#allocation2 + $0x30] sm:$0xff]  ;;  %v2273_v53 = vpop.f32.mrb[34].mxu0 }
 0x135   : > { %v1541_v52 = vadd.f32 %v2262_v31, %v1533_v48  ;;  %v1531_v55 = vld [vmem:[#allocation2 + $0x20] sm:$0xff]  ;;  %v1761_v2 = vpop.f32.mrb[35].mxu0 }
 0x136   : > { %v1775_v47 = vld [vmem:[#allocation2 + $0x10] sm:$0xff]  ;;  %v1539_v59 = vadd.f32 %v1531_v55, %v1512_v38  ;;  %v1534_v60 = vld [vmem:[#allocation2 + $0x38] sm:$0xff] }
 0x137   : > { %v1783_v49 = vadd.f32 %v2268_v26, %v1775_v47  ;;  %v1773_v50 = vld [vmem:[#allocation2] sm:$0xff]  ;;  %1549 = vst.msk [vmem:[#allocation2 + $0x30] sm:$0xff] %vm361_vm5, %v1541_v52  ;;  %v1542_v63 = vadd.f32 %v2263_v44, %v1534_v60  ;;  %v1532_v0 = vld [vmem:[#allocation2 + $0x28] sm:$0xff] }
 0x138   : > { %v1781_v56 = vadd.f32 %v1773_v50, %v1742_v32  ;;  %v1776_v57 = vld [vmem:[#allocation2 + $0x18] sm:$0xff]  ;;  %1547 = vst.msk [vmem:[#allocation2 + $0x20] sm:$0xff] %vm361_vm5, %v1539_v59  ;;  %v1540_v3 = vadd.f32 %v1532_v0, %v1515_v34 }
 0x139   : > { %1791 = vst.msk [vmem:[#allocation2 + $0x10] sm:$0xff] %vm361_vm5, %v1783_v49  ;;  %v1784_v61 = vadd.f32 %v2269_v41, %v1776_v57  ;;  %v1774_v62 = vld [vmem:[#allocation2 + $0x8] sm:$0xff]  ;;  %1550 = vst.msk [vmem:[#allocation2 + $0x38] sm:$0xff] %vm361_vm5, %v1542_v63 }
 0x13a   : > { %1789 = vst.msk [vmem:[#allocation2] sm:$0xff] %vm361_vm5, %v1781_v56  ;;  %v1782_v1 = vadd.f32 %v1774_v62, %v1745_v45  ;;  %1548 = vst.msk [vmem:[#allocation2 + $0x28] sm:$0xff] %vm361_vm5, %v1540_v3 }
 0x13b   : > { %1792 = vst.msk [vmem:[#allocation2 + $0x18] sm:$0xff] %vm361_vm5, %v1784_v61 }
 0x13c   : > { %1790 = vst.msk [vmem:[#allocation2 + $0x8] sm:$0xff] %vm361_vm5, %v1782_v1 }
 0x13e   : > { %v1779_v8 = vld [vmem:[#allocation2 + $0x30] sm:$0xff] }
 0x13f   : > { %v1787_v10 = vadd.f32 %v2272_v51, %v1779_v8  ;;  %v1777_v11 = vld [vmem:[#allocation2 + $0x20] sm:$0xff] }
 0x140   : > { %v1799_v5 = vld [vmem:[#allocation2 + $0x10] sm:$0xff]  ;;  %v1785_v14 = vadd.f32 %v1777_v11, %v1758_v58  ;;  %v1780_v15 = vld [vmem:[#allocation2 + $0x38] sm:$0xff] }
 0x141   : > { %v1814_v6 = vadd.f32 %v2135_v4, %v1799_v5  ;;  %v1797_v7 = vld [vmem:[#allocation2] sm:$0xff]  ;;  %1795 = vst.msk [vmem:[#allocation2 + $0x30] sm:$0xff] %vm361_vm5, %v1787_v10  ;;  %v1788_v17 = vadd.f32 %v2273_v53, %v1780_v15  ;;  %v1778_v18 = vld [vmem:[#allocation2 + $0x28] sm:$0xff] }
 0x142   : > { %v1812_v40 = vadd.f32 %v2135_v4, %v1797_v7  ;;  %v1800_v9 = vld [vmem:[#allocation2 + $0x18] sm:$0xff]  ;;  %1793 = vst.msk [vmem:[#allocation2 + $0x20] sm:$0xff] %vm361_vm5, %v1785_v14  ;;  %v1786_v19 = vadd.f32 %v1778_v18, %v1761_v2 }
 0x143   : > { %1822 = vst.msk [vmem:[%s2699_s21 + $0x10] sm:$0xff] %vm361_vm5, %v1814_v6  ;;  %v1815_v12 = vadd.f32 %v2135_v4, %v1800_v9  ;;  %v1798_v13 = vld [vmem:[#allocation2 + $0x8] sm:$0xff]  ;;  %1796 = vst.msk [vmem:[#allocation2 + $0x38] sm:$0xff] %vm361_vm5, %v1788_v17 }
 0x144   : > { %1820 = vst.msk [vmem:[%s2699_s21] sm:$0xff] %vm361_vm5, %v1812_v40  ;;  %v1813_v16 = vadd.f32 %v2135_v4, %v1798_v13  ;;  %1794 = vst.msk [vmem:[#allocation2 + $0x28] sm:$0xff] %vm361_vm5, %v1786_v19 }
 0x145   : > { %1823 = vst.msk [vmem:[%s2699_s21 + $0x18] sm:$0xff] %vm361_vm5, %v1815_v12 }
 0x146   : > { %1821 = vst.msk [vmem:[%s2699_s21 + $0x8] sm:$0xff] %vm361_vm5, %v1813_v16 }
 0x148   : > { %v1803_v20 = vld [vmem:[#allocation2 + $0x30] sm:$0xff] }
 0x149   : > { %v1818_v21 = vadd.f32 %v2135_v4, %v1803_v20  ;;  %v1801_v54 = vld [vmem:[#allocation2 + $0x20] sm:$0xff] }
 0x14a   : > { %v1816_v22 = vadd.f32 %v2135_v4, %v1801_v54  ;;  %v1804_v23 = vld [vmem:[#allocation2 + $0x38] sm:$0xff] }
 0x14b   : > { %1826 = vst.msk [vmem:[%s2699_s21 + $0x30] sm:$0xff] %vm361_vm5, %v1818_v21  ;;  %v1819_v24 = vadd.f32 %v2135_v4, %v1804_v23  ;;  %v1802_v25 = vld [vmem:[#allocation2 + $0x28] sm:$0xff] }
 0x14c   : > { %1824 = vst.msk [vmem:[%s2699_s21 + $0x20] sm:$0xff] %vm361_vm5, %v1816_v22  ;;  %v1817_v26 = vadd.f32 %v2135_v4, %v1802_v25 }
 0x14d   : > { %1827 = vst.msk [vmem:[%s2699_s21 + $0x38] sm:$0xff] %vm361_vm5, %v1819_v24 }
 0x14e   : > { %1825 = vst.msk [vmem:[%s2699_s21 + $0x28] sm:$0xff] %vm361_vm5, %v1817_v26 }
 0x14f PF: > { %s13_s14 = sadd.s32 1, %s2357_s14   ;;  %s2736_s12 = smov %s2353_s13 }
 0x150   : > { %p10_p6 = scmp.ge.s32.totalorder %s13_s14, 4   ;;  %s2737_s13 = smov %s2739_s15 }
 0x152   :  { %12 = sbr.rel (!%p10_p6) target bundleno = 2 (0x2), region = 82 }

</bundles_post_ra>
